<compile_context>
chip_gen: v6e
topology: v6e:2x2x1
jax: 0.10.0
libtpu: 0.0.40
codegen_flags: <defaults>
</compile_context>

<pallas_src>
import jax
import jax.numpy as jnp
from jax import lax
from jax.experimental import pallas as pl
from jax.experimental.pallas import tpu as pltpu


TILE_B = 256  # lane tile (batch on the lane axis)


# --------------------------------------------------------------------------- #
# Kernel
# --------------------------------------------------------------------------- #
def _make_tt_kernel(n_pairs, tail, unroll=8):
    """tail = 1: last core consumes one site; tail = 2: leftover middle core was
    fused into the last core, so it consumes the final two sites."""

    def kernel(x_ref, a_first_ref, a_pair_ref, a_last_ref, out_ref,
               pcc_ref, pcs_ref, psc_ref, pss_ref):
        # x_ref: (N, TB) bf16 pixels, rows permuted as
        #   [site0 | pair-lo sites (1,3,5,..) | pair-hi sites (2,4,6,..) | tail site(s)]
        # a_first: (D, 2) bf16 | a_pair: (n_pairs, D, 4D) bf16
        # a_last: (out_dim, 2D or 4D) bf16 | out: (out_dim, TB) f32
        # p??_ref: (n_pairs, TB) f32 VMEM scratch holding per-pair phi products.

        # Full-vreg trig precompute: EUP work hoisted off the serial chain.
        ang = (0.5 * jnp.pi) * x_ref[...].astype(jnp.float32)          # (N, TB)
        c = jnp.cos(ang)
        s = jnp.sin(ang)

        lo0, hi0 = 1, 1 + n_pairs
        c_lo, s_lo = c[lo0:lo0 + n_pairs], s[lo0:lo0 + n_pairs]        # (n_pairs, TB)
        c_hi, s_hi = c[hi0:hi0 + n_pairs], s[hi0:hi0 + n_pairs]
        # Pair feature products (outer index = later site), full-vreg VPU.
        pcc_ref[...] = c_hi * c_lo
        pcs_ref[...] = c_hi * s_lo
        psc_ref[...] = s_hi * c_lo
        pss_ref[...] = s_hi * s_lo

        # --- site 0 --------------------------------------------------------- #
        phi0 = jnp.concatenate([c[0:1], s[0:1]], axis=0).astype(jnp.bfloat16)   # (2, TB)
        v = jnp.dot(a_first_ref[...], phi0,
                    preferred_element_type=jnp.float32)                          # (D, TB)

        # --- pairwise-merged middle chain ------------------------------------ #
        # One (D, 4D) @ (4D, TB) bf16 matmul per TWO original sites (f32 accumulate).
        def body(j, v):
            w = jnp.concatenate(
                [v * pcc_ref[pl.ds(j, 1), :],
                 v * pcs_ref[pl.ds(j, 1), :],
                 v * psc_ref[pl.ds(j, 1), :],
                 v * pss_ref[pl.ds(j, 1), :]],
                axis=0).astype(jnp.bfloat16)                                      # (4D, TB)
            return jnp.dot(a_pair_ref[j], w,
                           preferred_element_type=jnp.float32)                    # (D, TB)

        v = lax.fori_loop(0, n_pairs, body, v, unroll=min(unroll, n_pairs))

        # --- tail site(s) with the output leg -------------------------------- #
        t0 = 1 + 2 * n_pairs
        if tail == 1:
            w = jnp.concatenate([v * c[t0:t0 + 1], v * s[t0:t0 + 1]],
                                axis=0).astype(jnp.bfloat16)                      # (2D, TB)
        else:
            cL, sL = c[t0:t0 + 1], s[t0:t0 + 1]            # site N-2 (earlier)
            cH, sH = c[t0 + 1:t0 + 2], s[t0 + 1:t0 + 2]    # site N-1 (output leg)
            w = jnp.concatenate([v * (cH * cL), v * (cH * sL),
                                 v * (sH * cL), v * (sH * sL)],
                                axis=0).astype(jnp.bfloat16)                      # (4D, TB)
        out_ref[...] = jnp.dot(a_last_ref[...], w,
                               preferred_element_type=jnp.float32).astype(out_ref.dtype)

    return kernel


# --------------------------------------------------------------------------- #
# Parameters
# --------------------------------------------------------------------------- #
def make_tt_params(key, n_sites, in_bond, hidden_bond, out_dim, std=0.01):
    """Synthetic per-site TT cores (float32, near-identity on the bond legs):
       a_first[k, d], a_mid[i, k, d*D + h], a_last[o, d*D + h]."""
    assert n_sites >= 4 and in_bond == 2
    k1, k2, k3 = jax.random.split(key, 3)
    D = hidden_bond
    a_first = std * jax.random.normal(k1, (D, in_bond), jnp.float32) + 1.0 / in_bond
    base = jnp.tile(jnp.eye(D, dtype=jnp.float32), (1, in_bond)) / in_bond
    a_mid = base[None] + std * jax.random.normal(
        k2, (n_sites - 2, D, in_bond * D), jnp.float32)
    a_last = (std * jax.random.normal(k3, (out_dim, in_bond * D), jnp.float32)
              + 1.0 / (in_bond * D))
    return a_first, a_mid, a_last


def fuse_tt_params(a_first, a_mid, a_last):
    """Merge adjacent middle cores pairwise (exact contraction over the shared bond)
    and cast everything to bf16 for the MXU. If the middle-site count is odd, the
    leftover middle core is folded into the output core (tail=2)."""
    D, in_bond = a_first.shape
    assert in_bond == 2
    out_dim = a_last.shape[0]
    n_mid = a_mid.shape[0]
    n_pairs = n_mid // 2
    assert n_pairs >= 1
    mid = a_mid.reshape(n_mid, D, in_bond, D).astype(jnp.float32)   # [i, k, d, h]
    lo = mid[0:2 * n_pairs:2]          # sites 1, 3, 5, ... (earlier in each pair)
    hi = mid[1:2 * n_pairs:2]          # sites 2, 4, 6, ... (later in each pair)
    # A_pair[k, e, d, h] = sum_m hi[k, e, m] * lo[m, d, h]
    a_pair = jnp.einsum('pkem,pmdh->pkedh', hi, lo).reshape(
        n_pairs, D, in_bond * in_bond * D)
    if n_mid % 2 == 1:                 # fold leftover middle core into output core
        last = a_last.reshape(out_dim, in_bond, D).astype(jnp.float32)
        a_last_f = jnp.einsum('oem,mdh->oedh', last, mid[-1]).reshape(
            out_dim, in_bond * in_bond * D)
        tail = 2
    else:
        a_last_f = a_last
        tail = 1
    return (a_first.astype(jnp.bfloat16), a_pair.astype(jnp.bfloat16),
            a_last_f.astype(jnp.bfloat16), tail)


def _site_permutation(n_pairs, tail):
    lo = list(range(1, 2 * n_pairs, 2))
    hi = list(range(2, 2 * n_pairs + 1, 2))
    n = 1 + 2 * n_pairs + tail
    return [0] + lo + hi + list(range(2 * n_pairs + 1, n))


# --------------------------------------------------------------------------- #
# Wrapper
# --------------------------------------------------------------------------- #
def ttnet_forward(x, fused_params, *, tile_b=TILE_B):
    """x: (B, C=1, H, W) NCHW float32  ->  (B, out_dim) logits."""
    a_first, a_pair, a_last, tail = fused_params
    B = x.shape[0]
    D, in_bond = a_first.shape
    n_pairs = a_pair.shape[0]
    out_dim = a_last.shape[0]
    last_w = a_last.shape[1]
    N = 1 + 2 * n_pairs + tail

    pix = x.reshape(B, -1)
    assert pix.shape[1] == N

    # v7x has 2 TensorCores sharded over the "parallel" batch axis: prefer >=2
    # grid tiles when there is at least 2*128 lanes of real batch.
    if B >= 2 * 128 and pl.cdiv(B, tile_b) < 2:
        tile_b = 128 * pl.cdiv(B, 2 * 128)
    b_pad = pl.cdiv(B, tile_b) * tile_b

    # Batch on the lane axis (lane-dense stores); bf16 pixels halve the HBM read.
    # Padded lanes see pixel 0 -> phi=(1,0): harmless, sliced off below.
    perm = jnp.asarray(_site_permutation(n_pairs, tail), dtype=jnp.int32)
    pix_t = jnp.pad(pix[:, perm].astype(jnp.bfloat16).T, ((0, 0), (0, b_pad - B)))

    flops_per_lane = 2 * (D * in_bond + n_pairs * D * (4 * D) + out_dim * last_w)
    core_bytes = 2 * (a_first.size + a_pair.size + a_last.size)
    vmem_est = (2 * N * tile_b * 2                  # pixel tile (double-buffered bf16)
                + 2 * core_bytes                    # resident cores (w/ headroom)
                + 2 * out_dim * tile_b * 4          # output tile
                + 4 * max(n_pairs, 8) * tile_b * 4  # pair-product scratch
                + 4 * N * tile_b * 4)               # cos/sin temporaries + slack
    vmem_limit = int(min(max(4 * vmem_est, 32 << 20), 48 << 20))

    out_t = pl.pallas_call(
        _make_tt_kernel(n_pairs, tail),
        out_shape=jax.ShapeDtypeStruct((out_dim, b_pad), jnp.float32),
        grid=(b_pad // tile_b,),
        in_specs=[
            pl.BlockSpec((N, tile_b), lambda i: (0, i)),            # pixel tile (pipelined)
            pl.BlockSpec((D, in_bond), lambda i: (0, 0)),           # cores: resident
            pl.BlockSpec((n_pairs, D, 4 * D), lambda i: (0, 0, 0)),
            pl.BlockSpec((out_dim, last_w), lambda i: (0, 0)),
        ],
        out_specs=pl.BlockSpec((out_dim, tile_b), lambda i: (0, i)),  # lane-dense store
        scratch_shapes=[pltpu.VMEM((n_pairs, tile_b), jnp.float32) for _ in range(4)],
        compiler_params=pltpu.CompilerParams(
            dimension_semantics=("parallel",),       # batch tiles shard across TCs on v7x
            vmem_limit_bytes=vmem_limit,
        ),
        cost_estimate=pl.CostEstimate(
            flops=int(flops_per_lane * b_pad),
            transcendentals=int(2 * N * b_pad),
            bytes_accessed=int(pix_t.size * 2 + core_bytes + out_dim * b_pad * 4),
        ),
    )(pix_t, a_first, a_pair, a_last)                               # (out_dim, b_pad)

    return out_t.T[:B].reshape(-1, out_dim)                         # matches x.view(-1, out_dim)


# --------------------------------------------------------------------------- #
# References
# --------------------------------------------------------------------------- #
def ttnet_reference_fp32(x, raw_params):
    """Per-site TT/MPS chain in float32 (module semantics, unfused cores)."""
    a_first, a_mid, a_last = raw_params
    B = x.shape[0]
    pix = x.reshape(B, -1).astype(jnp.float32)
    N = pix.shape[1]
    out_dim = a_last.shape[0]
    c = jnp.cos(0.5 * jnp.pi * pix)
    s = jnp.sin(0.5 * jnp.pi * pix)
    v = jnp.dot(jnp.stack([c[:, 0], s[:, 0]], axis=1), a_first.T)          # (B, D)
    for i in range(1, N - 1):
        w = jnp.concatenate([v * c[:, i:i + 1], v * s[:, i:i + 1]], axis=1)
        v = jnp.dot(w, a_mid[i - 1].T)
    w = jnp.concatenate([v * c[:, N - 1:N], v * s[:, N - 1:N]], axis=1)
    return jnp.dot(w, a_last.T).reshape(-1, out_dim)


def ttnet_reference_fused(x, fused_params):
    """Pure-JAX reference with the SAME fused cores / precision as the kernel."""
    a_first, a_pair, a_last, tail = fused_params
    B = x.shape[0]
    n_pairs = a_pair.shape[0]
    out_dim = a_last.shape[0]
    N = 1 + 2 * n_pairs + tail
    pix = x.reshape(B, -1).astype(jnp.bfloat16).astype(jnp.float32)
    c = jnp.cos(0.5 * jnp.pi * pix)
    s = jnp.sin(0.5 * jnp.pi * pix)
    phi0 = jnp.stack([c[:, 0], s[:, 0]], axis=1).astype(jnp.bfloat16)
    v = jnp.dot(phi0, a_first.T, preferred_element_type=jnp.float32)       # (B, D)

    def pair_w(v, lo, hi):
        return jnp.concatenate(
            [v * (c[:, hi:hi + 1] * c[:, lo:lo + 1]),
             v * (c[:, hi:hi + 1] * s[:, lo:lo + 1]),
             v * (s[:, hi:hi + 1] * c[:, lo:lo + 1]),
             v * (s[:, hi:hi + 1] * s[:, lo:lo + 1])], axis=1).astype(jnp.bfloat16)

    for j in range(n_pairs):
        w = pair_w(v, 1 + 2 * j, 2 + 2 * j)
        v = jnp.dot(w, a_pair[j].T, preferred_element_type=jnp.float32)
    if tail == 1:
        t = N - 1
        w = jnp.concatenate([v * c[:, t:t + 1], v * s[:, t:t + 1]],
                            axis=1).astype(jnp.bfloat16)
    else:
        w = pair_w(v, N - 2, N - 1)
    out = jnp.dot(w, a_last.T, preferred_element_type=jnp.float32)
    return out.reshape(-1, out_dim)


# --------------------------------------------------------------------------- #
if __name__ == "__main__":
    # Small shapes consistent with the module: batch=2, channel=1, 4x4 "image"
    # (lengthX=4, lengthY=4 -> N=16 sites), in_bond=2, hidden_bond=4, out_dim=10.
    B, C, H, W = 2, 1, 4, 4
    in_bond, hidden_bond, out_dim, std = 2, 4, 10, 0.01
    n_sites = H * W

    key = jax.random.PRNGKey(0)
    kx, kp = jax.random.split(key)
    x = jax.random.uniform(kx, (B, C, H, W), jnp.float32)     # pixel values in [0, 1)
    raw_params = make_tt_params(kp, n_sites, in_bond, hidden_bond, out_dim, std)
    fused_params = fuse_tt_params(*raw_params)

    y = jax.block_until_ready(ttnet_forward(x, fused_params))
    y_ref = jax.block_until_ready(ttnet_reference_fused(x, fused_params))
    y_f32 = jax.block_until_ready(ttnet_reference_fp32(x, raw_params))

    assert y.shape == (B, out_dim)
    assert jnp.allclose(y, y_ref, rtol=2e-2, atol=1e-6), \
        "Pallas kernel mismatch vs matched-precision reference"
    assert jnp.allclose(y, y_f32, rtol=1e-1, atol=1e-4), \
        "Pallas kernel mismatch vs float32 per-site reference"

    print("KERNEL_OK")
</pallas_src>

<mosaic_0001>
module attributes {stable_mosaic.version = 11 : i64} {
  func.func @kernel(%arg0: i32, %arg1: memref<16x256xbf16, #tpu.memory_space<vmem>>, %arg2: memref<4x2xbf16, #tpu.memory_space<vmem>>, %arg3: memref<7x4x16xbf16, #tpu.memory_space<vmem>>, %arg4: memref<10x8xbf16, #tpu.memory_space<vmem>>, %arg5: memref<10x256xf32, #tpu.memory_space<vmem>>, %arg6: memref<7x256xf32, #tpu.memory_space<vmem>>, %arg7: memref<7x256xf32, #tpu.memory_space<vmem>>, %arg8: memref<7x256xf32, #tpu.memory_space<vmem>>, %arg9: memref<7x256xf32, #tpu.memory_space<vmem>>) attributes {dimension_semantics = [#tpu.dimension_semantics<parallel>], iteration_bounds = array<i64: 1>, scalar_prefetch = 0 : i64, scratch_operands = 4 : i64, tpu.core_type = #tpu.core_type<tc>, window_params = [{transform_indices = @transform_0, window_bounds = array<i64: 16, 256>}, {pipeline_mode = #tpu.pipeline_mode<synchronous>, transform_indices = @transform_1, window_bounds = array<i64: 4, 2>}, {pipeline_mode = #tpu.pipeline_mode<synchronous>, transform_indices = @transform_2, window_bounds = array<i64: 7, 4, 16>}, {pipeline_mode = #tpu.pipeline_mode<synchronous>, transform_indices = @transform_3, window_bounds = array<i64: 10, 8>}, {transform_indices = @transform_4, window_bounds = array<i64: 10, 256>}]} {
    %c0 = arith.constant 0 : index
    %c0_0 = arith.constant 0 : index
    %0 = vector.load %arg1[%c0, %c0_0] : memref<16x256xbf16, #tpu.memory_space<vmem>>, vector<16x256xbf16>
    %1 = arith.extf %0 : vector<16x256xbf16> to vector<16x256xf32>
    %cst = arith.constant 1.57079637 : f32
    %2 = vector.broadcast %cst : f32 to vector<16x256xf32>
    %3 = arith.mulf %2, %1 : vector<16x256xf32>
    %4 = math.cos %3 : vector<16x256xf32>
    %5 = math.sin %3 : vector<16x256xf32>
    %6 = vector.extract_strided_slice %4 {offsets = [1, 0], sizes = [7, 256], strides = [1, 1]} : vector<16x256xf32> to vector<7x256xf32>
    %7 = vector.extract_strided_slice %5 {offsets = [1, 0], sizes = [7, 256], strides = [1, 1]} : vector<16x256xf32> to vector<7x256xf32>
    %8 = vector.extract_strided_slice %4 {offsets = [8, 0], sizes = [7, 256], strides = [1, 1]} : vector<16x256xf32> to vector<7x256xf32>
    %9 = vector.extract_strided_slice %5 {offsets = [8, 0], sizes = [7, 256], strides = [1, 1]} : vector<16x256xf32> to vector<7x256xf32>
    %10 = arith.mulf %8, %6 : vector<7x256xf32>
    %c0_1 = arith.constant 0 : index
    %c0_2 = arith.constant 0 : index
    %11 = vector.load %arg6[%c0_1, %c0_2] : memref<7x256xf32, #tpu.memory_space<vmem>>, vector<7x256xf32>
    tpu.vector_store %arg6[%c0_1, %c0_2], %10 {strides = array<i32>} : memref<7x256xf32, #tpu.memory_space<vmem>>, vector<7x256xf32>,
    %12 = arith.mulf %8, %7 : vector<7x256xf32>
    %c0_3 = arith.constant 0 : index
    %c0_4 = arith.constant 0 : index
    %13 = vector.load %arg7[%c0_3, %c0_4] : memref<7x256xf32, #tpu.memory_space<vmem>>, vector<7x256xf32>
    tpu.vector_store %arg7[%c0_3, %c0_4], %12 {strides = array<i32>} : memref<7x256xf32, #tpu.memory_space<vmem>>, vector<7x256xf32>,
    %14 = arith.mulf %9, %6 : vector<7x256xf32>
    %c0_5 = arith.constant 0 : index
    %c0_6 = arith.constant 0 : index
    %15 = vector.load %arg8[%c0_5, %c0_6] : memref<7x256xf32, #tpu.memory_space<vmem>>, vector<7x256xf32>
    tpu.vector_store %arg8[%c0_5, %c0_6], %14 {strides = array<i32>} : memref<7x256xf32, #tpu.memory_space<vmem>>, vector<7x256xf32>,
    %16 = arith.mulf %9, %7 : vector<7x256xf32>
    %c0_7 = arith.constant 0 : index
    %c0_8 = arith.constant 0 : index
    %17 = vector.load %arg9[%c0_7, %c0_8] : memref<7x256xf32, #tpu.memory_space<vmem>>, vector<7x256xf32>
    tpu.vector_store %arg9[%c0_7, %c0_8], %16 {strides = array<i32>} : memref<7x256xf32, #tpu.memory_space<vmem>>, vector<7x256xf32>,
    %18 = vector.extract_strided_slice %4 {offsets = [0, 0], sizes = [1, 256], strides = [1, 1]} : vector<16x256xf32> to vector<1x256xf32>
    %19 = vector.extract_strided_slice %5 {offsets = [0, 0], sizes = [1, 256], strides = [1, 1]} : vector<16x256xf32> to vector<1x256xf32>
    %20 = tpu.concatenate %18, %19 in 0 : vector<1x256xf32>, vector<1x256xf32> -> vector<2x256xf32>
    %21 = arith.truncf %20 : vector<2x256xf32> to vector<2x256xbf16>
    %c0_9 = arith.constant 0 : index
    %c0_10 = arith.constant 0 : index
    %22 = vector.load %arg2[%c0_9, %c0_10] : memref<4x2xbf16, #tpu.memory_space<vmem>>, vector<4x2xbf16>
    %cst_11 = arith.constant dense<0.000000e+00> : vector<4x256xf32>
    %23 = tpu.matmul %22, %21, %cst_11 {dimension_numbers = #tpu.dot_dimension_numbers<[1], [0], [0], [1], [0, 0, 1, 1], [], []>} : vector<4x2xbf16>, vector<2x256xbf16>, vector<4x256xf32> -> vector<4x256xf32>
    %c0_i32 = arith.constant 0 : i32
    %24 = arith.index_cast %c0_i32 : i32 to index
    %c0_12 = arith.constant 0 : index
    %25 = vector.load %arg6[%24, %c0_12] : memref<7x256xf32, #tpu.memory_space<vmem>>, vector<1x256xf32>
    %26 = vector.broadcast %25 : vector<1x256xf32> to vector<4x256xf32>
    %27 = arith.mulf %23, %26 : vector<4x256xf32>
    %28 = arith.index_cast %c0_i32 : i32 to index
    %c0_13 = arith.constant 0 : index
    %29 = vector.load %arg7[%28, %c0_13] : memref<7x256xf32, #tpu.memory_space<vmem>>, vector<1x256xf32>
    %30 = vector.broadcast %29 : vector<1x256xf32> to vector<4x256xf32>
    %31 = arith.mulf %23, %30 : vector<4x256xf32>
    %32 = arith.index_cast %c0_i32 : i32 to index
    %c0_14 = arith.constant 0 : index
    %33 = vector.load %arg8[%32, %c0_14] : memref<7x256xf32, #tpu.memory_space<vmem>>, vector<1x256xf32>
    %34 = vector.broadcast %33 : vector<1x256xf32> to vector<4x256xf32>
    %35 = arith.mulf %23, %34 : vector<4x256xf32>
    %36 = arith.index_cast %c0_i32 : i32 to index
    %c0_15 = arith.constant 0 : index
    %37 = vector.load %arg9[%36, %c0_15] : memref<7x256xf32, #tpu.memory_space<vmem>>, vector<1x256xf32>
    %38 = vector.broadcast %37 : vector<1x256xf32> to vector<4x256xf32>
    %39 = arith.mulf %23, %38 : vector<4x256xf32>
    %40 = tpu.concatenate %27, %31, %35, %39 in 0 : vector<4x256xf32>, vector<4x256xf32>, vector<4x256xf32>, vector<4x256xf32> -> vector<16x256xf32>
    %41 = arith.truncf %40 : vector<16x256xf32> to vector<16x256xbf16>
    %42 = arith.index_cast %c0_i32 : i32 to index
    %c0_16 = arith.constant 0 : index
    %c0_17 = arith.constant 0 : index
    %43 = vector.load %arg3[%42, %c0_16, %c0_17] : memref<7x4x16xbf16, #tpu.memory_space<vmem>>, vector<1x4x16xbf16>
    %44 = vector.shape_cast %43 : vector<1x4x16xbf16> to vector<4x16xbf16>
    %cst_18 = arith.constant dense<0.000000e+00> : vector<4x256xf32>
    %45 = tpu.matmul %44, %41, %cst_18 {dimension_numbers = #tpu.dot_dimension_numbers<[1], [0], [0], [1], [0, 0, 1, 1], [], []>} : vector<4x16xbf16>, vector<16x256xbf16>, vector<4x256xf32> -> vector<4x256xf32>
    %c1_i32 = arith.constant 1 : i32
    %46 = arith.index_cast %c1_i32 : i32 to index
    %c0_19 = arith.constant 0 : index
    %47 = vector.load %arg6[%46, %c0_19] : memref<7x256xf32, #tpu.memory_space<vmem>>, vector<1x256xf32>
    %48 = vector.broadcast %47 : vector<1x256xf32> to vector<4x256xf32>
    %49 = arith.mulf %45, %48 : vector<4x256xf32>
    %50 = arith.index_cast %c1_i32 : i32 to index
    %c0_20 = arith.constant 0 : index
    %51 = vector.load %arg7[%50, %c0_20] : memref<7x256xf32, #tpu.memory_space<vmem>>, vector<1x256xf32>
    %52 = vector.broadcast %51 : vector<1x256xf32> to vector<4x256xf32>
    %53 = arith.mulf %45, %52 : vector<4x256xf32>
    %54 = arith.index_cast %c1_i32 : i32 to index
    %c0_21 = arith.constant 0 : index
    %55 = vector.load %arg8[%54, %c0_21] : memref<7x256xf32, #tpu.memory_space<vmem>>, vector<1x256xf32>
    %56 = vector.broadcast %55 : vector<1x256xf32> to vector<4x256xf32>
    %57 = arith.mulf %45, %56 : vector<4x256xf32>
    %58 = arith.index_cast %c1_i32 : i32 to index
    %c0_22 = arith.constant 0 : index
    %59 = vector.load %arg9[%58, %c0_22] : memref<7x256xf32, #tpu.memory_space<vmem>>, vector<1x256xf32>
    %60 = vector.broadcast %59 : vector<1x256xf32> to vector<4x256xf32>
    %61 = arith.mulf %45, %60 : vector<4x256xf32>
    %62 = tpu.concatenate %49, %53, %57, %61 in 0 : vector<4x256xf32>, vector<4x256xf32>, vector<4x256xf32>, vector<4x256xf32> -> vector<16x256xf32>
    %63 = arith.truncf %62 : vector<16x256xf32> to vector<16x256xbf16>
    %64 = arith.index_cast %c1_i32 : i32 to index
    %c0_23 = arith.constant 0 : index
    %c0_24 = arith.constant 0 : index
    %65 = vector.load %arg3[%64, %c0_23, %c0_24] : memref<7x4x16xbf16, #tpu.memory_space<vmem>>, vector<1x4x16xbf16>
    %66 = vector.shape_cast %65 : vector<1x4x16xbf16> to vector<4x16xbf16>
    %cst_25 = arith.constant dense<0.000000e+00> : vector<4x256xf32>
    %67 = tpu.matmul %66, %63, %cst_25 {dimension_numbers = #tpu.dot_dimension_numbers<[1], [0], [0], [1], [0, 0, 1, 1], [], []>} : vector<4x16xbf16>, vector<16x256xbf16>, vector<4x256xf32> -> vector<4x256xf32>
    %c2_i32 = arith.constant 2 : i32
    %68 = arith.index_cast %c2_i32 : i32 to index
    %c0_26 = arith.constant 0 : index
    %69 = vector.load %arg6[%68, %c0_26] : memref<7x256xf32, #tpu.memory_space<vmem>>, vector<1x256xf32>
    %70 = vector.broadcast %69 : vector<1x256xf32> to vector<4x256xf32>
    %71 = arith.mulf %67, %70 : vector<4x256xf32>
    %72 = arith.index_cast %c2_i32 : i32 to index
    %c0_27 = arith.constant 0 : index
    %73 = vector.load %arg7[%72, %c0_27] : memref<7x256xf32, #tpu.memory_space<vmem>>, vector<1x256xf32>
    %74 = vector.broadcast %73 : vector<1x256xf32> to vector<4x256xf32>
    %75 = arith.mulf %67, %74 : vector<4x256xf32>
    %76 = arith.index_cast %c2_i32 : i32 to index
    %c0_28 = arith.constant 0 : index
    %77 = vector.load %arg8[%76, %c0_28] : memref<7x256xf32, #tpu.memory_space<vmem>>, vector<1x256xf32>
    %78 = vector.broadcast %77 : vector<1x256xf32> to vector<4x256xf32>
    %79 = arith.mulf %67, %78 : vector<4x256xf32>
    %80 = arith.index_cast %c2_i32 : i32 to index
    %c0_29 = arith.constant 0 : index
    %81 = vector.load %arg9[%80, %c0_29] : memref<7x256xf32, #tpu.memory_space<vmem>>, vector<1x256xf32>
    %82 = vector.broadcast %81 : vector<1x256xf32> to vector<4x256xf32>
    %83 = arith.mulf %67, %82 : vector<4x256xf32>
    %84 = tpu.concatenate %71, %75, %79, %83 in 0 : vector<4x256xf32>, vector<4x256xf32>, vector<4x256xf32>, vector<4x256xf32> -> vector<16x256xf32>
    %85 = arith.truncf %84 : vector<16x256xf32> to vector<16x256xbf16>
    %86 = arith.index_cast %c2_i32 : i32 to index
    %c0_30 = arith.constant 0 : index
    %c0_31 = arith.constant 0 : index
    %87 = vector.load %arg3[%86, %c0_30, %c0_31] : memref<7x4x16xbf16, #tpu.memory_space<vmem>>, vector<1x4x16xbf16>
    %88 = vector.shape_cast %87 : vector<1x4x16xbf16> to vector<4x16xbf16>
    %cst_32 = arith.constant dense<0.000000e+00> : vector<4x256xf32>
    %89 = tpu.matmul %88, %85, %cst_32 {dimension_numbers = #tpu.dot_dimension_numbers<[1], [0], [0], [1], [0, 0, 1, 1], [], []>} : vector<4x16xbf16>, vector<16x256xbf16>, vector<4x256xf32> -> vector<4x256xf32>
    %c3_i32 = arith.constant 3 : i32
    %90 = arith.index_cast %c3_i32 : i32 to index
    %c0_33 = arith.constant 0 : index
    %91 = vector.load %arg6[%90, %c0_33] : memref<7x256xf32, #tpu.memory_space<vmem>>, vector<1x256xf32>
    %92 = vector.broadcast %91 : vector<1x256xf32> to vector<4x256xf32>
    %93 = arith.mulf %89, %92 : vector<4x256xf32>
    %94 = arith.index_cast %c3_i32 : i32 to index
    %c0_34 = arith.constant 0 : index
    %95 = vector.load %arg7[%94, %c0_34] : memref<7x256xf32, #tpu.memory_space<vmem>>, vector<1x256xf32>
    %96 = vector.broadcast %95 : vector<1x256xf32> to vector<4x256xf32>
    %97 = arith.mulf %89, %96 : vector<4x256xf32>
    %98 = arith.index_cast %c3_i32 : i32 to index
    %c0_35 = arith.constant 0 : index
    %99 = vector.load %arg8[%98, %c0_35] : memref<7x256xf32, #tpu.memory_space<vmem>>, vector<1x256xf32>
    %100 = vector.broadcast %99 : vector<1x256xf32> to vector<4x256xf32>
    %101 = arith.mulf %89, %100 : vector<4x256xf32>
    %102 = arith.index_cast %c3_i32 : i32 to index
    %c0_36 = arith.constant 0 : index
    %103 = vector.load %arg9[%102, %c0_36] : memref<7x256xf32, #tpu.memory_space<vmem>>, vector<1x256xf32>
    %104 = vector.broadcast %103 : vector<1x256xf32> to vector<4x256xf32>
    %105 = arith.mulf %89, %104 : vector<4x256xf32>
    %106 = tpu.concatenate %93, %97, %101, %105 in 0 : vector<4x256xf32>, vector<4x256xf32>, vector<4x256xf32>, vector<4x256xf32> -> vector<16x256xf32>
    %107 = arith.truncf %106 : vector<16x256xf32> to vector<16x256xbf16>
    %108 = arith.index_cast %c3_i32 : i32 to index
    %c0_37 = arith.constant 0 : index
    %c0_38 = arith.constant 0 : index
    %109 = vector.load %arg3[%108, %c0_37, %c0_38] : memref<7x4x16xbf16, #tpu.memory_space<vmem>>, vector<1x4x16xbf16>
    %110 = vector.shape_cast %109 : vector<1x4x16xbf16> to vector<4x16xbf16>
    %cst_39 = arith.constant dense<0.000000e+00> : vector<4x256xf32>
    %111 = tpu.matmul %110, %107, %cst_39 {dimension_numbers = #tpu.dot_dimension_numbers<[1], [0], [0], [1], [0, 0, 1, 1], [], []>} : vector<4x16xbf16>, vector<16x256xbf16>, vector<4x256xf32> -> vector<4x256xf32>
    %c4_i32 = arith.constant 4 : i32
    %112 = arith.index_cast %c4_i32 : i32 to index
    %c0_40 = arith.constant 0 : index
    %113 = vector.load %arg6[%112, %c0_40] : memref<7x256xf32, #tpu.memory_space<vmem>>, vector<1x256xf32>
    %114 = vector.broadcast %113 : vector<1x256xf32> to vector<4x256xf32>
    %115 = arith.mulf %111, %114 : vector<4x256xf32>
    %116 = arith.index_cast %c4_i32 : i32 to index
    %c0_41 = arith.constant 0 : index
    %117 = vector.load %arg7[%116, %c0_41] : memref<7x256xf32, #tpu.memory_space<vmem>>, vector<1x256xf32>
    %118 = vector.broadcast %117 : vector<1x256xf32> to vector<4x256xf32>
    %119 = arith.mulf %111, %118 : vector<4x256xf32>
    %120 = arith.index_cast %c4_i32 : i32 to index
    %c0_42 = arith.constant 0 : index
    %121 = vector.load %arg8[%120, %c0_42] : memref<7x256xf32, #tpu.memory_space<vmem>>, vector<1x256xf32>
    %122 = vector.broadcast %121 : vector<1x256xf32> to vector<4x256xf32>
    %123 = arith.mulf %111, %122 : vector<4x256xf32>
    %124 = arith.index_cast %c4_i32 : i32 to index
    %c0_43 = arith.constant 0 : index
    %125 = vector.load %arg9[%124, %c0_43] : memref<7x256xf32, #tpu.memory_space<vmem>>, vector<1x256xf32>
    %126 = vector.broadcast %125 : vector<1x256xf32> to vector<4x256xf32>
    %127 = arith.mulf %111, %126 : vector<4x256xf32>
    %128 = tpu.concatenate %115, %119, %123, %127 in 0 : vector<4x256xf32>, vector<4x256xf32>, vector<4x256xf32>, vector<4x256xf32> -> vector<16x256xf32>
    %129 = arith.truncf %128 : vector<16x256xf32> to vector<16x256xbf16>
    %130 = arith.index_cast %c4_i32 : i32 to index
    %c0_44 = arith.constant 0 : index
    %c0_45 = arith.constant 0 : index
    %131 = vector.load %arg3[%130, %c0_44, %c0_45] : memref<7x4x16xbf16, #tpu.memory_space<vmem>>, vector<1x4x16xbf16>
    %132 = vector.shape_cast %131 : vector<1x4x16xbf16> to vector<4x16xbf16>
    %cst_46 = arith.constant dense<0.000000e+00> : vector<4x256xf32>
    %133 = tpu.matmul %132, %129, %cst_46 {dimension_numbers = #tpu.dot_dimension_numbers<[1], [0], [0], [1], [0, 0, 1, 1], [], []>} : vector<4x16xbf16>, vector<16x256xbf16>, vector<4x256xf32> -> vector<4x256xf32>
    %c5_i32 = arith.constant 5 : i32
    %134 = arith.index_cast %c5_i32 : i32 to index
    %c0_47 = arith.constant 0 : index
    %135 = vector.load %arg6[%134, %c0_47] : memref<7x256xf32, #tpu.memory_space<vmem>>, vector<1x256xf32>
    %136 = vector.broadcast %135 : vector<1x256xf32> to vector<4x256xf32>
    %137 = arith.mulf %133, %136 : vector<4x256xf32>
    %138 = arith.index_cast %c5_i32 : i32 to index
    %c0_48 = arith.constant 0 : index
    %139 = vector.load %arg7[%138, %c0_48] : memref<7x256xf32, #tpu.memory_space<vmem>>, vector<1x256xf32>
    %140 = vector.broadcast %139 : vector<1x256xf32> to vector<4x256xf32>
    %141 = arith.mulf %133, %140 : vector<4x256xf32>
    %142 = arith.index_cast %c5_i32 : i32 to index
    %c0_49 = arith.constant 0 : index
    %143 = vector.load %arg8[%142, %c0_49] : memref<7x256xf32, #tpu.memory_space<vmem>>, vector<1x256xf32>
    %144 = vector.broadcast %143 : vector<1x256xf32> to vector<4x256xf32>
    %145 = arith.mulf %133, %144 : vector<4x256xf32>
    %146 = arith.index_cast %c5_i32 : i32 to index
    %c0_50 = arith.constant 0 : index
    %147 = vector.load %arg9[%146, %c0_50] : memref<7x256xf32, #tpu.memory_space<vmem>>, vector<1x256xf32>
    %148 = vector.broadcast %147 : vector<1x256xf32> to vector<4x256xf32>
    %149 = arith.mulf %133, %148 : vector<4x256xf32>
    %150 = tpu.concatenate %137, %141, %145, %149 in 0 : vector<4x256xf32>, vector<4x256xf32>, vector<4x256xf32>, vector<4x256xf32> -> vector<16x256xf32>
    %151 = arith.truncf %150 : vector<16x256xf32> to vector<16x256xbf16>
    %152 = arith.index_cast %c5_i32 : i32 to index
    %c0_51 = arith.constant 0 : index
    %c0_52 = arith.constant 0 : index
    %153 = vector.load %arg3[%152, %c0_51, %c0_52] : memref<7x4x16xbf16, #tpu.memory_space<vmem>>, vector<1x4x16xbf16>
    %154 = vector.shape_cast %153 : vector<1x4x16xbf16> to vector<4x16xbf16>
    %cst_53 = arith.constant dense<0.000000e+00> : vector<4x256xf32>
    %155 = tpu.matmul %154, %151, %cst_53 {dimension_numbers = #tpu.dot_dimension_numbers<[1], [0], [0], [1], [0, 0, 1, 1], [], []>} : vector<4x16xbf16>, vector<16x256xbf16>, vector<4x256xf32> -> vector<4x256xf32>
    %c6_i32 = arith.constant 6 : i32
    %156 = arith.index_cast %c6_i32 : i32 to index
    %c0_54 = arith.constant 0 : index
    %157 = vector.load %arg6[%156, %c0_54] : memref<7x256xf32, #tpu.memory_space<vmem>>, vector<1x256xf32>
    %158 = vector.broadcast %157 : vector<1x256xf32> to vector<4x256xf32>
    %159 = arith.mulf %155, %158 : vector<4x256xf32>
    %160 = arith.index_cast %c6_i32 : i32 to index
    %c0_55 = arith.constant 0 : index
    %161 = vector.load %arg7[%160, %c0_55] : memref<7x256xf32, #tpu.memory_space<vmem>>, vector<1x256xf32>
    %162 = vector.broadcast %161 : vector<1x256xf32> to vector<4x256xf32>
    %163 = arith.mulf %155, %162 : vector<4x256xf32>
    %164 = arith.index_cast %c6_i32 : i32 to index
    %c0_56 = arith.constant 0 : index
    %165 = vector.load %arg8[%164, %c0_56] : memref<7x256xf32, #tpu.memory_space<vmem>>, vector<1x256xf32>
    %166 = vector.broadcast %165 : vector<1x256xf32> to vector<4x256xf32>
    %167 = arith.mulf %155, %166 : vector<4x256xf32>
    %168 = arith.index_cast %c6_i32 : i32 to index
    %c0_57 = arith.constant 0 : index
    %169 = vector.load %arg9[%168, %c0_57] : memref<7x256xf32, #tpu.memory_space<vmem>>, vector<1x256xf32>
    %170 = vector.broadcast %169 : vector<1x256xf32> to vector<4x256xf32>
    %171 = arith.mulf %155, %170 : vector<4x256xf32>
    %172 = tpu.concatenate %159, %163, %167, %171 in 0 : vector<4x256xf32>, vector<4x256xf32>, vector<4x256xf32>, vector<4x256xf32> -> vector<16x256xf32>
    %173 = arith.truncf %172 : vector<16x256xf32> to vector<16x256xbf16>
    %174 = arith.index_cast %c6_i32 : i32 to index
    %c0_58 = arith.constant 0 : index
    %c0_59 = arith.constant 0 : index
    %175 = vector.load %arg3[%174, %c0_58, %c0_59] : memref<7x4x16xbf16, #tpu.memory_space<vmem>>, vector<1x4x16xbf16>
    %176 = vector.shape_cast %175 : vector<1x4x16xbf16> to vector<4x16xbf16>
    %cst_60 = arith.constant dense<0.000000e+00> : vector<4x256xf32>
    %177 = tpu.matmul %176, %173, %cst_60 {dimension_numbers = #tpu.dot_dimension_numbers<[1], [0], [0], [1], [0, 0, 1, 1], [], []>} : vector<4x16xbf16>, vector<16x256xbf16>, vector<4x256xf32> -> vector<4x256xf32>
    %c7_i32 = arith.constant 7 : i32
    %178 = vector.extract_strided_slice %4 {offsets = [15, 0], sizes = [1, 256], strides = [1, 1]} : vector<16x256xf32> to vector<1x256xf32>
    %179 = vector.broadcast %178 : vector<1x256xf32> to vector<4x256xf32>
    %180 = arith.mulf %177, %179 : vector<4x256xf32>
    %181 = vector.extract_strided_slice %5 {offsets = [15, 0], sizes = [1, 256], strides = [1, 1]} : vector<16x256xf32> to vector<1x256xf32>
    %182 = vector.broadcast %181 : vector<1x256xf32> to vector<4x256xf32>
    %183 = arith.mulf %177, %182 : vector<4x256xf32>
    %184 = tpu.concatenate %180, %183 in 0 : vector<4x256xf32>, vector<4x256xf32> -> vector<8x256xf32>
    %185 = arith.truncf %184 : vector<8x256xf32> to vector<8x256xbf16>
    %c0_61 = arith.constant 0 : index
    %c0_62 = arith.constant 0 : index
    %186 = vector.load %arg4[%c0_61, %c0_62] : memref<10x8xbf16, #tpu.memory_space<vmem>>, vector<10x8xbf16>
    %cst_63 = arith.constant dense<0.000000e+00> : vector<10x256xf32>
    %187 = tpu.matmul %186, %185, %cst_63 {dimension_numbers = #tpu.dot_dimension_numbers<[1], [0], [0], [1], [0, 0, 1, 1], [], []>} : vector<10x8xbf16>, vector<8x256xbf16>, vector<10x256xf32> -> vector<10x256xf32>
    %c0_64 = arith.constant 0 : index
    %c0_65 = arith.constant 0 : index
    %188 = vector.load %arg5[%c0_64, %c0_65] : memref<10x256xf32, #tpu.memory_space<vmem>>, vector<10x256xf32>
    tpu.vector_store %arg5[%c0_64, %c0_65], %187 {strides = array<i32>} : memref<10x256xf32, #tpu.memory_space<vmem>>, vector<10x256xf32>,
    return
  }
  func.func @transform_0(%arg0: i32) -> (i32, i32) {
    %c0_i32 = arith.constant 0 : i32
    %c0_i32_0 = arith.constant 0 : i32
    return %c0_i32, %arg0 : i32, i32
  }
  func.func @transform_1(%arg0: i32) -> (i32, i32) {
    %c0_i32 = arith.constant 0 : i32
    %c0_i32_0 = arith.constant 0 : i32
    %c0_i32_1 = arith.constant 0 : i32
    return %c0_i32, %c0_i32_0 : i32, i32
  }
  func.func @transform_2(%arg0: i32) -> (i32, i32, i32) {
    %c0_i32 = arith.constant 0 : i32
    %c0_i32_0 = arith.constant 0 : i32
    %c0_i32_1 = arith.constant 0 : i32
    %c0_i32_2 = arith.constant 0 : i32
    return %c0_i32, %c0_i32_0, %c0_i32_1 : i32, i32, i32
  }
  func.func @transform_3(%arg0: i32) -> (i32, i32) {
    %c0_i32 = arith.constant 0 : i32
    %c0_i32_0 = arith.constant 0 : i32
    %c0_i32_1 = arith.constant 0 : i32
    return %c0_i32, %c0_i32_0 : i32, i32
  }
  func.func @transform_4(%arg0: i32) -> (i32, i32) {
    %c0_i32 = arith.constant 0 : i32
    %c0_i32_0 = arith.constant 0 : i32
    return %c0_i32, %arg0 : i32, i32
  }
}

</mosaic_0001>

<bundles_post_ra>
// kernel: tpu_custom_call.1
= control target key start
LH: loop header
LB: loop body
LE: loop exit
PB: predicated region body
PF: predicated region fallthrough
CT: control target
= control target key end

     0   :  { %9 = vsyncpa [#allocation7], 0  ;;  %s2589_s0 = inlined_call_operand.hbm [shape: bf16[16,256], index: 0, kind: input, shape index: {}]   ;;  %s2590_s1 = inlined_call_operand.vmem [shape: bf16[4,2], index: 1, kind: input, shape index: {}]   ;;  %s2591_s2 = inlined_call_operand.vmem [shape: bf16[7,4,16], index: 2, kind: input, shape index: {}]   ;;  %s2592_s3 = inlined_call_operand.vmem [shape: bf16[10,8], index: 3, kind: input, shape index: {}]   ;;  %s2593_s4 = inlined_call_operand.hbm [shape: f32[10,256], index: 4, kind: output, shape index: {}]  }
   0x1   :  { %10 = vsyncpa [#allocation8], 0  ;;  %s2076_s15 = smov [#allocation6]  }
   0x2   :  { %s16_s16 = sshll.u32 %s2076_s15, 4  ;;  %s17_s16 = int_to_ptr.vmem [resolvable:$true] %s16_s16 }
   0x3   :  { %s2040_s17 = scalar_lea.vmem %s17_s16, 256  ;;  %p2045_p1 = scmp.lt.s32.totalorder %s17_s16, %s17_s16 }
   0x4   :  { %p2041_p0 = scmp.ne.s32.totalorder %s17_s16, %s2040_s17  ;;  %p2046_p2 = scmp.lt.s32.totalorder %s2040_s17, %s2040_s17 }
   0x6   :  { %p2047_p3 = por %p2046_p2, %p2045_p1 }
   0x8   :  { %p2048_p4 = pnand %p2047_p3, %p2041_p0 }
   0xa   :  { %2051 = shalt.err (!%p2048_p4)
}
   0xb   :  { %s2077_s18 = smov 128   ;;  %s2078_s19 = smov 8  }
   0xc   :  { %22 = dma.hbm_to_vmem [thread:$0]  %s2589_s0, 256, %s17_s16, [#allocation7], %s2077_s18, %s2077_s18, %s2078_s19  }
   0xd   :  { %2072 = dma.done.wait [#allocation7], 256  }
   0xe   :  { %2073 = vsyncadd [#allocation7], 4294967040  ;;  %v33_v0 = vld [vmem:[#allocation6] sm:$0xff]  ;;  %v2117_v1 = vld [vmem:[#allocation6 + $0x8] sm:$0xff]  ;;  %v2079_v36 = vmov 683565275  }
   0xf   :  { %v36_v2 = vunpack.c.h.bf16 %v33_v0  ;;  %v38_v3 = vunpack.c.h.bf16 %v2117_v1  ;;  %v35_v4 = vunpack.c.l.bf16 %v33_v0  ;;  %v37_v26 = vunpack.c.l.bf16 %v2117_v1  ;;  %s2086_s11 = smov [#allocation9]  }
  0x10   :  { %v2080_v38 = vmov 2475754826   ;;  %v2081_v40 = vmov 2131351028   ;;  %v2082_v42 = vmov 2102212464  }
  0x11   :  { %v2120_v5 = vmul.f32 1.5707964, %v36_v2  ;;  %v2122_v6 = vmul.f32 1.5707964, %v38_v3  ;;  %v2124_v7 = vmul.f32 1.5707964, %v35_v4 }
  0x12   :  { %v2083_v44 = vmov 920167782   ;;  %v2084_v52 = vmov 1326507024   ;;  %s1924_s12 = sshll.u32 %s2086_s11, 4  ;;  %s1925_s12 = int_to_ptr.vmem [resolvable:$true] %s1924_s12 }
  0x13   :  { %v146_v8 = vand.u32 2147483647, %v2120_v5  ;;  %v149_v9 = vand.u32 2139095040, %v2120_v5  ;;  %v352_v10 = vand.u32 2147483647, %v2122_v6  ;;  %v355_v11 = vand.u32 2139095040, %v2122_v6  ;;  %p2057_p6 = scmp.lt.s32.totalorder %s1925_s12, %s1925_s12 }
  0x14   :  { %v46_v16 = vand.u32 2139095040, %v2124_v7  ;;  %v43_v30 = vand.u32 2147483647, %v2124_v7  ;;  %vm148_vm13 = vcmp.lt.s32.totalorder %v2120_v5, 0  ;;  %s2052_s13 = scalar_lea.vmem %s1925_s12, 512 }
  0x15   :  { %v150_v12 = vshrl.u32 %v149_v9, 23  ;;  %v153_v13 = vand.u32 8388607, %v146_v8  ;;  %v356_v14 = vshrl.u32 %v355_v11, 23  ;;  %v359_v15 = vand.u32 8388607, %v352_v10  ;;  %p2053_p5 = scmp.ne.s32.totalorder %s1925_s12, %s2052_s13  ;;  %p2058_p7 = scmp.lt.s32.totalorder %s2052_s13, %s2052_s13 }
  0x16   :  { %v47_v19 = vshrl.u32 %v46_v16, 23  ;;  %vm2240_vm14 = vcmp.le.f32.partialorder %v146_v8, 0.7853982 }
  0x17   :  { %v1940_v17 = vadd.s32 4294967169, %v150_v12  ;;  %v1948_v18 = vadd.s32 4294967169, %v356_v14  ;;  %v154_v21 = vor.u32 8388608, %v153_v13  ;;  %v360_v22 = vor.u32 8388608, %v359_v15  ;;  %p2059_p8 = por %p2058_p7, %p2057_p6 }
  0x18   :  { %v1936_v24 = vadd.s32 4294967169, %v47_v19 }
  0x19   :  { %v156_v20 = vadd.s32 1, %v1940_v17  ;;  %v362_v23 = vadd.s32 1, %v1948_v18  ;;  %v2137_v31 = vshll.u32 %v154_v21, 8  ;;  %v2139_v33 = vshll.u32 %v360_v22, 8  ;;  %p2060_p9 = pnand %p2059_p8, %p2053_p5 }
  0x1a   :  { %v2141_v34 = vadd.s32 1, %v1936_v24 }
  0x1b   :  { %vm157_vm0 = vcmp.gt.s32.totalorder %v156_v20, 0  ;;  %vm363_vm1 = vcmp.gt.s32.totalorder %v362_v23, 0 }
  0x1c   :  { %v158_v25 = vsel %vm157_vm0, %v156_v20, 0  ;;  %v364_v29 = vsel %vm363_vm1, %v362_v23, 0  ;;  %vm54_vm6 = vcmp.gt.s32.totalorder %v2141_v34, 0 }
  0x1d   :  { %v159_v27 = vshrl.u32 %v158_v25, 5  ;;  %v160_v28 = vand.u32 31, %v158_v25  ;;  %v366_v32 = vand.u32 31, %v364_v29  ;;  %v2148_v46 = vshrl.u32 %v364_v29, 5 }
  0x1f   :  { %v161_v35 = vsub.s32 32, %v160_v28  ;;  %v163_v37 = vshll.u32 %v2079_v36, %v160_v28  ;;  %v166_v39 = vshll.u32 %v2080_v38, %v160_v28  ;;  %v169_v41 = vshll.u32 %v2081_v40, %v160_v28 }
  0x20   :  { %v172_v43 = vshll.u32 %v2082_v42, %v160_v28  ;;  %v175_v45 = vshll.u32 %v2083_v44, %v160_v28  ;;  %vm178_vm2 = vcmp.lt.s32.totalorder %v159_v27, 1  ;;  %vm179_vm3 = vcmp.lt.s32.totalorder %v159_v27, 2 }
  0x21   :  { %v162_v47 = vshrl.u32 %v2079_v36, %v161_v35  ;;  %v164_v48 = vshrl.u32 %v2080_v38, %v161_v35  ;;  %v167_v49 = vshrl.u32 %v2081_v40, %v161_v35  ;;  %v170_v50 = vshrl.u32 %v2082_v42, %v161_v35 }
  0x22   :  { %v173_v51 = vshrl.u32 %v2083_v44, %v161_v35  ;;  %v176_v53 = vshrl.u32 %v2084_v52, %v161_v35  ;;  %vm181_vm4 = vcmp.lt.s32.totalorder %v159_v27, 4  ;;  %v367_v57 = vsub.s32 32, %v366_v32 }
  0x23   :  { %v165_v54 = vor.u32 %v164_v48, %v163_v37  ;;  %v168_v55 = vor.u32 %v167_v49, %v166_v39  ;;  %v171_v56 = vor.u32 %v170_v50, %v169_v41  ;;  %vm180_vm5 = vcmp.lt.s32.totalorder %v159_v27, 3 }
  0x24   :  { %v174_v58 = vor.u32 %v173_v51, %v172_v43  ;;  %v177_v59 = vor.u32 %v176_v53, %v175_v45  ;;  %v369_v60 = vshll.u32 %v2079_v36, %v366_v32  ;;  %v372_v9 = vshll.u32 %v2080_v38, %v366_v32 }
  0x25   :  { %v182_v61 = vsel %vm178_vm2, %v162_v47, %v165_v54  ;;  %v183_v62 = vsel %vm181_vm4, %v171_v56, 2102212464  ;;  %v186_v63 = vsel %vm178_vm2, %v165_v54, %v168_v55  ;;  %v190_v0 = vsel %vm178_vm2, %v168_v55, %v171_v56 }
  0x26   :  { %v184_v2 = vsel %vm180_vm5, %v168_v55, %v183_v62  ;;  %v187_v3 = vsel %vm181_vm4, %v174_v58, 920167782  ;;  %v191_v4 = vsel %vm181_vm4, %v177_v59, 1326507024  ;;  %v368_v13 = vshrl.u32 %v2079_v36, %v367_v57 }
  0x27   :  { %v188_v11 = vsel %vm180_vm5, %v171_v56, %v187_v3  ;;  %v192_v12 = vsel %vm180_vm5, %v174_v58, %v191_v4  ;;  %v370_v14 = vshrl.u32 %v2080_v38, %v367_v57  ;;  %v185_v15 = vsel %vm179_vm3, %v182_v61, %v184_v2 }
  0x28   :  { %v189_v16 = vsel %vm179_vm3, %v186_v63, %v188_v11  ;;  %v193_v17 = vsel %vm179_vm3, %v190_v0, %v192_v12  ;;  %v373_v18 = vshrl.u32 %v2081_v40, %v367_v57  ;;  %v375_v25 = vshll.u32 %v2081_v40, %v366_v32 }
  0x29   :  { %v2169_v19 = vmul.u32.u64.low %v2137_v31, %v193_v17  ;;  %v2170_v20 = vmul.u32.u64.high %v2137_v31, %v193_v17, %v2169_v19  ;;  %v2173_v21 = vmul.u32.u64.low %v2137_v31, %v189_v16  ;;  %v2174_v22 = vmul.u32.u64.high %v2137_v31, %v189_v16, %v2173_v21 }
  0x2a   :  { %v371_v23 = vor.u32 %v370_v14, %v369_v60  ;;  %v374_v24 = vor.u32 %v373_v18, %v372_v9  ;;  %v376_v28 = vshrl.u32 %v2082_v42, %v367_v57  ;;  %v378_v29 = vshll.u32 %v2082_v42, %v366_v32 }
  0x2b   :  { %v379_v27 = vshrl.u32 %v2083_v44, %v367_v57  ;;  %v381_v35 = vshll.u32 %v2083_v44, %v366_v32  ;;  %v382_v37 = vshrl.u32 %v2084_v52, %v367_v57  ;;  %v201_v39 = vmul.u32 %v2137_v31, %v185_v15 }
  0x2c   :  { %v377_v41 = vor.u32 %v376_v28, %v375_v25  ;;  %vm384_vm7 = vcmp.lt.s32.totalorder %v2148_v46, 1  ;;  %vm385_vm8 = vcmp.lt.s32.totalorder %v2148_v46, 2  ;;  %vm203_vm9 = vc.u32 %v2170_v20, %v2173_v21 }
  0x2d   :  { %v204_v43 = vadd.s32 1, %v2174_v22  ;;  %v380_v45 = vor.u32 %v379_v27, %v378_v29  ;;  %vm386_vm10 = vcmp.lt.s32.totalorder %v2148_v46, 3  ;;  %v383_v47 = vor.u32 %v382_v37, %v381_v35 }
  0x2e   :  { %vm387_vm11 = vcmp.lt.s32.totalorder %v2148_v46, 4  ;;  %v388_v32 = vsel %vm384_vm7, %v368_v13, %v371_v23  ;;  %v392_v48 = vsel %vm384_vm7, %v371_v23, %v374_v24  ;;  %v396_v51 = vsel %vm384_vm7, %v374_v24, %v377_v41 }
  0x2f   :  { %v205_v49 = vsel %vm203_vm9, %v204_v43, %v2174_v22  ;;  %v389_v31 = vsel %vm387_vm11, %v377_v41, 2102212464  ;;  %v393_v50 = vsel %vm387_vm11, %v380_v45, 920167782  ;;  %v397_v56 = vsel %vm387_vm11, %v383_v47, 1326507024 }
  0x30   :  { %v206_v53 = vadd.s32 %v205_v49, %v201_v39  ;;  %v390_v54 = vsel %vm386_vm10, %v374_v24, %v389_v31  ;;  %v394_v55 = vsel %vm386_vm10, %v377_v41, %v393_v50  ;;  %v398_v59 = vsel %vm386_vm10, %v380_v45, %v397_v56 }
  0x31   :  { %v391_v57 = vsel %vm385_vm8, %v388_v32, %v390_v54  ;;  %v395_v58 = vsel %vm385_vm8, %v392_v48, %v394_v55  ;;  %v55_v60 = vsel %vm54_vm6, %v2141_v34, 0  ;;  %v399_v62 = vsel %vm385_vm8, %v396_v51, %v398_v59 }
  0x32   :  { %v207_v61 = vadd.s32 536870912, %v206_v53  ;;  %v2200_v63 = vmul.u32.u64.low %v2139_v33, %v395_v58  ;;  %v2201_v0 = vmul.u32.u64.high %v2139_v33, %v395_v58, %v2200_v63  ;;  %v2210_v4 = vmul.f32 1.5707964, %v37_v26 }
  0x33   :  { %v2205_v2 = vmul.u32.u64.low %v2139_v33, %v399_v62  ;;  %v2206_v3 = vmul.u32.u64.high %v2139_v33, %v399_v62, %v2205_v2  ;;  %v50_v34 = vand.u32 8388607, %v43_v30  ;;  %v57_v11 = vand.u32 31, %v55_v60 }
  0x34   :  { %v208_v9 = vshrl.u32 %v207_v61, 30  ;;  %v407_v46 = vmul.u32 %v2139_v33, %v391_v57  ;;  %v410_v13 = vadd.s32 1, %v2201_v0  ;;  %v252_v15 = vand.u32 2139095040, %v2210_v4 }
  0x35   :  { %vm409_vm12 = vc.u32 %v2206_v3, %v2200_v63  ;;  %v51_v14 = vor.u32 8388608, %v50_v34  ;;  %v58_v26 = vsub.s32 32, %v57_v11  ;;  %v249_v19 = vand.u32 2147483647, %v2210_v4 }
  0x36   :  { %v209_v12 = vshll.u32 %v208_v9, 30  ;;  %v411_v1 = vsel %vm409_vm12, %v410_v13, %v2201_v0  ;;  %v202_v22 = vadd.s32 %v2173_v21, %v2170_v20  ;;  %v253_v24 = vshrl.u32 %v252_v15, 23 }
  0x37   :  { %v412_v17 = vadd.s32 %v411_v1, %v407_v46  ;;  %v2222_v23 = vshll.u32 %v51_v14, 8  ;;  %v56_v28 = vshrl.u32 %v55_v60, 5  ;;  %v66_v29 = vshll.u32 %v2081_v40, %v57_v11 }
  0x38   :  { %v210_v16 = vsub.s32 %v206_v53, %v209_v12  ;;  %v67_v27 = vshrl.u32 %v2082_v42, %v58_v26  ;;  %v60_v37 = vshll.u32 %v2079_v36, %v57_v11  ;;  %v61_v39 = vshrl.u32 %v2080_v38, %v58_v26 }
  0x39   :  { %v413_v33 = vadd.s32 536870912, %v412_v17  ;;  %v63_v20 = vshll.u32 %v2080_v38, %v57_v11  ;;  %v64_v41 = vshrl.u32 %v2081_v40, %v58_v26  ;;  %v69_v43 = vshll.u32 %v2082_v42, %v57_v11 }
  0x3a   :  { %v212_v18 = vsub.s32 0, %v210_v16  ;;  %v70_v45 = vshrl.u32 %v2083_v44, %v58_v26  ;;  %v72_v32 = vshll.u32 %v2083_v44, %v57_v11  ;;  %v73_v48 = vshrl.u32 %v2084_v52, %v58_v26 }
  0x3b   :  { %v2227_v35 = vshrl.u32 %v413_v33, 30  ;;  %v1944_v49 = vadd.s32 4294967169, %v253_v24  ;;  %v68_v51 = vor.u32 %v67_v27, %v66_v29  ;;  %vm75_vm15 = vcmp.lt.s32.totalorder %v56_v28, 1 }
  0x3c   :  { %v1941_v25 = vmin.u32 %v212_v18, %v210_v16  ;;  %vm78_vm0 = vcmp.lt.s32.totalorder %v56_v28, 4  ;;  %v232_v53 = vsub.s32 4, %v208_v9  ;;  %v59_v55 = vshrl.u32 %v2079_v36, %v58_v26 }
  0x3d   :  { %v415_v47 = vshll.u32 %v2227_v35, 30  ;;  %v62_v56 = vor.u32 %v61_v39, %v60_v37  ;;  %v65_v57 = vor.u32 %v64_v41, %v63_v20  ;;  %v71_v58 = vor.u32 %v70_v45, %v69_v43 }
  0x3e   :  { %v214_v21 = vclz %v1941_v25  ;;  %v80_v59 = vsel %vm78_vm0, %v68_v51, 2102212464  ;;  %v74_v61 = vor.u32 %v73_v48, %v72_v32  ;;  %vm76_vm2 = vcmp.lt.s32.totalorder %v56_v28, 2 }
  0x3f   :  { %v2244_v54 = vsub.s32 %v412_v17, %v415_v47  ;;  %vm77_vm3 = vcmp.lt.s32.totalorder %v56_v28, 3  ;;  %v233_v34 = vsel %vm148_vm13, %v232_v53, %v208_v9  ;;  %v79_v46 = vsel %vm75_vm15, %v59_v55, %v62_v56 }
  0x40   :  { %v1942_v50 = vadd.s32 4294967294, %v214_v21  ;;  %v81_v12 = vsel %vm77_vm3, %v65_v57, %v80_v59  ;;  %v83_v15 = vsel %vm75_vm15, %v62_v56, %v65_v57  ;;  %v84_v1 = vsel %vm78_vm0, %v71_v58, 920167782 }
  0x41   :  { %v418_v8 = vsub.s32 0, %v2244_v54  ;;  %v87_v17 = vsel %vm75_vm15, %v65_v57, %v68_v51  ;;  %v88_v18 = vsel %vm78_vm0, %v74_v61, 1326507024  ;;  %v408_v24 = vadd.s32 %v2200_v63, %v2206_v3 }
  0x42   :  { %vm1943_vm1 = vcmp.lt.s32.totalorder %v1942_v50, 0  ;;  %v235_v25 = vsel %vm2240_vm14, 0, %v233_v34  ;;  %v89_v37 = vsel %vm77_vm3, %v71_v58, %v88_v18  ;;  %v82_v21 = vsel %vm76_vm2, %v79_v46, %v81_v12 }
  0x43   :  { %v217_v60 = vsel %vm1943_vm1, 0, %v1942_v50  ;;  %v1949_v11 = vmin.u32 %v418_v8, %v2244_v54  ;;  %v90_v41 = vsel %vm76_vm2, %v87_v17, %v89_v37  ;;  %vm354_vm4 = vcmp.lt.s32.totalorder %v2122_v6, 0 }
  0x44   :  { %v218_v62 = vsub.s32 32, %v217_v60  ;;  %v219_v0 = vshll.u32 %v210_v16, %v217_v60  ;;  %v222_v2 = vsub.s32 4294967266, %v217_v60  ;;  %v85_v16 = vsel %vm77_vm3, %v68_v51, %v84_v1 }
  0x45   :  { %v420_v26 = vclz %v1949_v11  ;;  %v86_v27 = vsel %vm76_vm2, %v83_v15, %v85_v16  ;;  %v2273_v63 = vmul.u32.u64.low %v2222_v23, %v90_v41  ;;  %v2274_v3 = vmul.u32.u64.high %v2222_v23, %v90_v41, %v2273_v63 }
  0x46   :  { %v220_v13 = vshrl.u32 %v202_v22, %v218_v62  ;;  %v223_v14 = vadd.s32 127, %v222_v2  ;;  %v2263_v22 = vand.u32 8388607, %v249_v19  ;;  %v259_v43 = vadd.s32 1, %v1944_v49 }
  0x47   :  { %v1950_v29 = vadd.s32 4294967294, %v420_v26  ;;  %v2277_v32 = vmul.u32.u64.low %v2222_v23, %v86_v27  ;;  %v2278_v48 = vmul.u32.u64.high %v2222_v23, %v86_v27, %v2277_v32  ;;  %v652_v55 = vadd.s32 3, %v235_v25 }
  0x48   :  { %v221_v9 = vor.u32 %v220_v13, %v219_v0  ;;  %v224_v33 = vshll.u32 %v223_v14, 23  ;;  %vm260_vm6 = vcmp.gt.s32.totalorder %v259_v43, 0  ;;  %v257_v56 = vor.u32 8388608, %v2263_v22 }
  0x49   :  { %vm1951_vm5 = vcmp.lt.s32.totalorder %v1950_v29, 0  ;;  %v261_v57 = vsel %vm260_vm6, %v259_v43, 0  ;;  %vm2285_vm7 = vcmp.le.f32.partialorder %v352_v10, 0.7853982  ;;  %v98_v60 = vmul.u32 %v2222_v23, %v82_v21 }
  0x4a   :  { %v225_v39 = vor.u32 4788187, %v224_v33  ;;  %v228_v20 = vcvt.s32.f32 %v221_v9  ;;  %v423_v47 = vsel %vm1951_vm5, 0, %v1950_v29  ;;  %vm100_vm8 = vc.u32 %v2274_v3, %v2277_v32 }
  0x4b   :  { %v424_v50 = vsub.s32 32, %v423_v47  ;;  %v425_v51 = vshll.u32 %v2244_v54, %v423_v47  ;;  %v428_v28 = vsub.s32 4294967266, %v423_v47  ;;  %v438_v8 = vsub.s32 4, %v2227_v35 }
  0x4c   :  { %v226_v45 = vand.u32 2147483647, %v225_v39  ;;  %v101_v61 = vadd.s32 1, %v2278_v48  ;;  %v263_v62 = vand.u32 31, %v261_v57  ;;  %v2294_v0 = vand.u32 3, %v235_v25 }
  0x4d   :  { %v426_v58 = vshrl.u32 %v408_v24, %v424_v50  ;;  %v429_v59 = vadd.s32 127, %v428_v28  ;;  %v2298_v11 = vand.u32 3, %v652_v55  ;;  %v2085_v12 = vmov 0  }
  0x4e   :  { %v229_v53 = vmul.f32 %v228_v20, %v226_v45  ;;  %v102_v23 = vsel %vm100_vm8, %v101_v61, %v2278_v48  ;;  %v264_v46 = vsub.s32 32, %v263_v62  ;;  %951 = vmatprep.mubr.bf16.mxu0 %v2085_v12  ;;  %1072 = vmatprep.mubr.bf16.mxu1 %v2085_v12  ;;  %v439_v26 = vsel %vm354_vm4, %v438_v8, %v2227_v35 }
  0x4f   :  { %v427_v2 = vor.u32 %v426_v58, %v425_v51  ;;  %v430_v10 = vshll.u32 %v429_v59, 23  ;;  %v103_v1 = vadd.s32 %v102_v23, %v98_v60  ;;  %v266_v16 = vshll.u32 %v2079_v36, %v263_v62 }
  0x50   :  { %v230_v54 = vxor.u32 2147483648, %v229_v53  ;;  %v267_v17 = vshrl.u32 %v2080_v38, %v264_v46  ;;  %v269_v33 = vshll.u32 %v2080_v38, %v263_v62  ;;  %v270_v31 = vshrl.u32 %v2081_v40, %v264_v46 }
  0x51   :  { %v431_v14 = vor.u32 4788187, %v430_v10  ;;  %v434_v15 = vcvt.s32.f32 %v427_v2  ;;  %v104_v9 = vadd.s32 536870912, %v103_v1  ;;  %v272_v24 = vshll.u32 %v2081_v40, %v263_v62 }
  0x52   :  { %v231_v34 = vsel %vm148_vm13, %v230_v54, %v229_v53  ;;  %v273_v22 = vshrl.u32 %v2082_v42, %v264_v46  ;;  %v275_v25 = vshll.u32 %v2082_v42, %v263_v62  ;;  %v262_v35 = vshrl.u32 %v261_v57, 5 }
  0x53   :  { %v234_v13 = vsel %vm2240_vm14, %v2120_v5, %v231_v34  ;;  %v432_v18 = vand.u32 2147483647, %v431_v14  ;;  %v2316_v27 = vshrl.u32 %v104_v9, 30  ;;  %v276_v37 = vshrl.u32 %v2083_v44, %v264_v46 }
  0x54   :  { %2016 = vcosq.f32 %v234_v13  ;;  %v441_v39 = vsel %vm2285_vm7, 0, %v439_v26  ;;  %v278_v20 = vshll.u32 %v2083_v44, %v263_v62  ;;  %v279_v38 = vshrl.u32 %v2084_v52, %v264_v46 }
  0x55   :  { %2018 = vsinq.f32 %v234_v13  ;;  %v435_v29 = vmul.f32 %v434_v15, %v432_v18  ;;  %vm244_vm9 = vcmp.eq.s32.totalorder %v2294_v0, 2  ;;  %v106_v21 = vshll.u32 %v2316_v27, 30 }
  0x56   :  { %v265_v42 = vshrl.u32 %v2079_v36, %v264_v46  ;;  %v2326_v41 = vshll.u32 %v257_v56, 8  ;;  %vm241_vm10 = vcmp.eq.s32.totalorder %v2294_v0, 0  ;;  %v268_v63 = vor.u32 %v267_v17, %v266_v16 }
  0x57   :  { %v436_v40 = vxor.u32 2147483648, %v435_v29  ;;  %v271_v43 = vor.u32 %v270_v31, %v269_v33  ;;  %v274_v45 = vor.u32 %v273_v22, %v272_v24  ;;  %v277_v47 = vor.u32 %v276_v37, %v275_v25 }
  0x58   :  { %vm240_vm11 = vcmp.lt.s32.totalorder %v2294_v0, 2  ;;  %vm654_vm12 = vcmp.lt.s32.totalorder %v2298_v11, 2  ;;  %v2333_v52 = vsub.s32 %v103_v1, %v106_v21  ;;  %vm281_vm13 = vcmp.lt.s32.totalorder %v262_v35, 1 }
  0x59   :  { %v437_v44 = vsel %vm354_vm4, %v436_v40, %v435_v29  ;;  %vm284_vm14 = vcmp.lt.s32.totalorder %v262_v35, 4  ;;  %vm238_vm15 = vweird.f32 %v2120_v5  ;;  %v280_v48 = vor.u32 %v279_v38, %v278_v20 }
  0x5a   :  { %v440_v36 = vsel %vm2285_vm7, %v2122_v6, %v437_v44  ;;  %vm282_vm0 = vcmp.lt.s32.totalorder %v262_v35, 2  ;;  %v286_v50 = vsel %vm284_vm14, %v274_v45, 2102212464  ;;  %v109_v51 = vsub.s32 0, %v2333_v52 }
  0x5b   :  { %2020 = vcosq.f32 %v440_v36  ;;  %vm283_vm1 = vcmp.lt.s32.totalorder %v262_v35, 3  ;;  %v285_v28 = vsel %vm281_vm13, %v265_v42, %v268_v63  ;;  %v289_v55 = vsel %vm281_vm13, %v268_v63, %v271_v43 }
  0x5c   :  { %2022 = vsinq.f32 %v440_v36  ;;  %v287_v53 = vsel %vm283_vm1, %v271_v43, %v286_v50  ;;  %v290_v56 = vsel %vm284_vm14, %v277_v47, 920167782  ;;  %vm655_vm2 = vcmp.eq.s32.totalorder %v2298_v11, 0 }
  0x5d   :  { %vm658_vm3 = vcmp.eq.s32.totalorder %v2298_v11, 2  ;;  %vm903_vm4 = vcmask 1040384   ;;  %v1937_v57 = vmin.u32 %v109_v51, %v2333_v52  ;;  %v293_v49 = vsel %vm281_vm13, %v271_v43, %v274_v45 }
  0x5e   :  { %v2349_v58 = vand.u32 3, %v441_v39  ;;  %v860_v59 = vadd.s32 3, %v441_v39  ;;  %v291_v60 = vsel %vm283_vm1, %v274_v45, %v290_v56  ;;  %v294_v54 = vsel %vm284_vm14, %v280_v48, 1326507024 }
  0x5f   :  { %v111_v61 = vclz %v1937_v57  ;;  %v288_v62 = vsel %vm282_vm0, %v285_v28, %v287_v53  ;;  %v292_v2 = vsel %vm282_vm0, %v289_v55, %v291_v60  ;;  %v295_v10 = vsel %vm283_vm1, %v277_v47, %v294_v54 }
  0x60   :  { %v296_v46 = vsel %vm282_vm0, %v293_v49, %v295_v10  ;;  %v2358_v13 = vmul.u32.u64.low %v2326_v41, %v292_v2  ;;  %v2359_v14 = vmul.u32.u64.high %v2326_v41, %v292_v2, %v2358_v13  ;;  %v861_v9 = vand.u32 3, %v860_v59 }
  0x61   :  { %v2017_v8 = vpop.eup %2016  ;;  %v1938_v1 = vadd.s32 4294967294, %v111_v61  ;;  %v2363_v26 = vmul.u32.u64.low %v2326_v41, %v296_v46  ;;  %v2364_v16 = vmul.u32.u64.high %v2326_v41, %v296_v46, %v2363_v26  ;;  %v99_v33 = vadd.s32 %v2277_v32, %v2274_v3 }
  0x62   :  { %v2019_v34 = vpop.eup %2018  ;;  %v245_v23 = vxor.u32 2147483648, %v2017_v8  ;;  %vm444_vm5 = vweird.f32 %v2122_v6  ;;  %v304_v22 = vmul.u32 %v2326_v41, %v288_v62  ;;  %v307_v3 = vadd.s32 1, %v2359_v14 }
  0x63   :  { %v242_v15 = vxor.u32 2147483648, %v2019_v34  ;;  %vm1939_vm6 = vcmp.lt.s32.totalorder %v1938_v1, 0  ;;  %vm446_vm7 = vcmp.lt.s32.totalorder %v2349_v58, 2  ;;  %vm447_vm8 = vcmp.eq.s32.totalorder %v2349_v58, 0 }
  0x64   :  { %v246_v17 = vsel %vm244_vm9, %v245_v23, %v2019_v34  ;;  %v660_v18 = vsel %vm658_vm3, %v245_v23, %v2019_v34  ;;  %v114_v35 = vsel %vm1939_vm6, 0, %v1938_v1  ;;  %vm450_vm9 = vcmp.eq.s32.totalorder %v2349_v58, 2 }
  0x65   :  { %v243_v31 = vsel %vm241_vm10, %v2017_v8, %v242_v15  ;;  %v657_v24 = vsel %vm655_vm2, %v2017_v8, %v242_v15  ;;  %v115_v39 = vsub.s32 32, %v114_v35  ;;  %v116_v20 = vshll.u32 %v2333_v52, %v114_v35 }
  0x66   :  { %v247_v25 = vsel %vm240_vm11, %v243_v31, %v246_v17  ;;  %v661_v29 = vsel %vm654_vm12, %v657_v24, %v660_v18  ;;  %v119_v38 = vsub.s32 4294967266, %v114_v35  ;;  %vm863_vm10 = vcmp.eq.s32.totalorder %v861_v9, 0 }
  0x67   :  { %v248_v32 = vsel %vm238_vm15, nan, %v247_v25  ;;  %v662_v37 = vsel %vm238_vm15, nan, %v661_v29  ;;  %v117_v11 = vshrl.u32 %v99_v33, %v115_v39  ;;  %vm306_vm11 = vc.u32 %v2364_v16, %v2358_v13 }
  0x68   :  { %v900_v0 = vrot.slane %v662_v37, 7  ;;  %v2021_v40 = vpop.eup %2020  ;;  %vm866_vm12 = vcmp.eq.s32.totalorder %v861_v9, 2  ;;  %v120_v21 = vadd.s32 127, %v119_v38  ;;  %v308_v42 = vsel %vm306_vm11, %v307_v3, %v2359_v14 }
  0x69   :  { %v2023_v41 = vpop.eup %2022  ;;  %v451_v63 = vxor.u32 2147483648, %v2021_v40  ;;  %v118_v45 = vor.u32 %v117_v11, %v116_v20  ;;  %v309_v47 = vadd.s32 %v308_v42, %v304_v22  ;;  %vm862_vm13 = vcmp.lt.s32.totalorder %v861_v9, 2 }
  0x6a   :  { %v905_v5 = vsel %vm903_vm4, %v248_v32, %v900_v0  ;;  %v448_v44 = vxor.u32 2147483648, %v2023_v41  ;;  %v874_v52 = vrot.slane %v248_v32, 1  ;;  %v121_v36 = vshll.u32 %v120_v21, 23 }
  0x6b   :  { %v907_v43 = vpack.c.bf16 %v905_v5, %v905_v5  ;;  %v452_v48 = vsel %vm450_vm9, %v451_v63, %v2023_v41  ;;  %v868_v50 = vsel %vm866_vm12, %v451_v63, %v2023_v41  ;;  %v884_v51 = vrot.slane %v662_v37, 1 }
  0x6c   :  { %v310_v28 = vadd.s32 536870912, %v309_v47  ;;  %v449_v53 = vsel %vm447_vm8, %v2021_v40, %v448_v44  ;;  %v865_v55 = vsel %vm863_vm10, %v2021_v40, %v448_v44  ;;  %v122_v56 = vor.u32 4788187, %v121_v36 }
  0x6d   :  { %1968 = vmatprep.subr.msk.bf16.mxu0 %vm903_vm4, %v907_v43  ;;  %v125_v57 = vcvt.s32.f32 %v118_v45  ;;  %v453_v49 = vsel %vm446_vm7, %v449_v53, %v452_v48  ;;  %v869_v59 = vsel %vm862_vm13, %v865_v55, %v868_v50  ;;  %vm45_vm14 = vcmp.lt.s32.totalorder %v2124_v7, 0 }
  0x6e   :  { %v2403_v60 = vshrl.u32 %v310_v28, 30  ;;  %v2407_v54 = vsel %vm444_vm5, nan, %v453_v49  ;;  %v2411_v8 = vsel %vm444_vm5, nan, %v869_v59  ;;  %v123_v61 = vand.u32 2147483647, %v122_v56 }
  0x6f   :  { %v878_v62 = vmul.f32 %v874_v52, %v2407_v54  ;;  %v888_v2 = vmul.f32 %v884_v51, %v2407_v54  ;;  %v892_v10 = vmul.f32 %v874_v52, %v2411_v8  ;;  %v896_v58 = vmul.f32 %v884_v51, %v2411_v8 }
  0x70   :  { %v126_v34 = vmul.f32 %v125_v57, %v123_v61  ;;  %v312_v23 = vshll.u32 %v2403_v60, 30  ;;  %v129_v6 = vsub.s32 4, %v2316_v27  ;;  %vm44_vm15 = vcmp.le.f32.partialorder %v43_v30, 0.7853982 }
  0x71   :  { %880 = vst [vmem:[#allocation2 + $0x8] sm:$0x7f] %v878_v62  ;;  %890 = vst [vmem:[#allocation3 + $0x8] sm:$0x7f] %v888_v2  ;;  %v305_v22 = vadd.s32 %v2358_v13, %v2364_v16  ;;  %vm135_vm8 = vweird.f32 %v2124_v7  ;;  %vm251_vm9 = vcmp.lt.s32.totalorder %v2210_v4, 0  ;;  %v335_v52 = vsub.s32 4, %v2403_v60 }
  0x72   :  { %894 = vst [vmem:[#allocation4 + $0x8] sm:$0x7f] %v892_v10  ;;  %898 = vst [vmem:[#allocation5 + $0x8] sm:$0x7f] %v896_v58  ;;  %v127_v46 = vxor.u32 2147483648, %v126_v34  ;;  %v313_v14 = vsub.s32 %v309_v47, %v312_v23  ;;  %v130_v26 = vsel %vm45_vm14, %v129_v6, %v2316_v27  ;;  %vm909_vm11 = vcmask 15360  }
  0x73   :  { %v132_v9 = vsel %vm44_vm15, 0, %v130_v26  ;;  %vm250_vm10 = vcmp.le.f32.partialorder %v249_v19, 0.7853982  ;;  %v336_v28 = vsel %vm251_vm9, %v335_v52, %v2403_v60  ;;  %v908_v19 = vld [vmem:[%s2590_s1] sm:$0x3] }
  0x74   :  { %v128_v15 = vsel %vm45_vm14, %v127_v46, %v126_v34  ;;  %v315_v1 = vsub.s32 0, %v313_v14  ;;  %v548_v24 = vadd.s32 3, %v132_v9  ;;  %v136_v3 = vand.u32 3, %v132_v9 }
  0x75   :  { %v131_v17 = vsel %vm44_vm15, %v2124_v7, %v128_v15  ;;  %v338_v57 = vsel %vm250_vm10, 0, %v336_v28  ;;  %vm341_vm15 = vweird.f32 %v2210_v4 }
  0x76   :  { %2024 = vcosq.f32 %v131_v17  ;;  %v1945_v18 = vmin.u32 %v315_v1, %v313_v14  ;;  %v549_v32 = vand.u32 3, %v548_v24  ;;  %vm138_vm1 = vcmp.eq.s32.totalorder %v136_v3, 0 }
  0x77   :  { %2026 = vsinq.f32 %v131_v17  ;;  %vm141_vm2 = vcmp.eq.s32.totalorder %v136_v3, 2  ;;  %vm137_vm6 = vcmp.lt.s32.totalorder %v136_v3, 2  ;;  %v756_v49 = vadd.s32 3, %v338_v57 }
  0x78   :  { %v317_v33 = vclz %v1945_v18  ;;  %vm554_vm3 = vcmp.eq.s32.totalorder %v549_v32, 2  ;;  %vm551_vm5 = vcmp.eq.s32.totalorder %v549_v32, 0  ;;  %vm550_vm7 = vcmp.lt.s32.totalorder %v549_v32, 2 }
  0x79   :  { %v342_v59 = vand.u32 3, %v338_v57  ;;  %v757_v60 = vand.u32 3, %v756_v49  ;;  %v1035_v57 = vld [vmem:[%s2591_s2] sm:$0x3] }
  0x7a   :  { %v1946_v31 = vadd.s32 4294967294, %v317_v33 }
  0x7b   :  { %vm347_vm12 = vcmp.eq.s32.totalorder %v342_v59, 2  ;;  %vm762_vm13 = vcmp.eq.s32.totalorder %v757_v60, 2  ;;  %vm344_vm14 = vcmp.eq.s32.totalorder %v342_v59, 0 }
  0x7c   :  { %vm1947_vm0 = vcmp.lt.s32.totalorder %v1946_v31, 0 }
  0x7d   :  { %v320_v30 = vsel %vm1947_vm0, 0, %v1946_v31  ;;  %vm343_vm0 = vcmp.lt.s32.totalorder %v342_v59, 2  ;;  %v962_v31 = vlaneseq }
  0x7e   :  { %v321_v25 = vsub.s32 32, %v320_v30  ;;  %v322_v29 = vshll.u32 %v313_v14, %v320_v30  ;;  %v325_v35 = vsub.s32 4294967266, %v320_v30 }
  0x7f   :  { %v2448_v24 = vshrl.u32 %v962_v31, 7 }
  0x80   :  { %v323_v27 = vshrl.u32 %v305_v22, %v321_v25  ;;  %v326_v37 = vadd.s32 127, %v325_v35 }
  0x81   :  { %v2451_v22 = vsub.s32 0, %v2448_v24 }
  0x82   :  { %v324_v39 = vor.u32 %v323_v27, %v322_v29  ;;  %v327_v20 = vshll.u32 %v326_v37, 23  ;;  %v2454_v29 = vsub.s32 1, %v2448_v24 }
  0x83   :  { %v2025_v0 = vpop.eup %2024 }
  0x84   :  { %v2027_v38 = vpop.eup %2026  ;;  %v142_v11 = vxor.u32 2147483648, %v2025_v0  ;;  %v328_v40 = vor.u32 4788187, %v327_v20  ;;  %v331_v5 = vcvt.s32.f32 %v324_v39 }
  0x85   :  { %v139_v13 = vxor.u32 2147483648, %v2027_v38 }
  0x86   :  { %v143_v16 = vsel %vm141_vm2, %v142_v11, %v2027_v38  ;;  %v329_v21 = vand.u32 2147483647, %v328_v40  ;;  %v556_v42 = vsel %vm554_vm3, %v142_v11, %v2027_v38  ;;  %vm1028_vm2 = vcmask 1043456  }
  0x87   :  { %v140_v41 = vsel %vm138_vm1, %v2025_v0, %v139_v13  ;;  %v553_v63 = vsel %vm551_vm5, %v2025_v0, %v139_v13  ;;  %vm758_vm1 = vcmp.lt.s32.totalorder %v757_v60, 2  ;;  %vm1036_vm3 = vcmask 130048  }
  0x88   :  { %v144_v43 = vsel %vm137_vm6, %v140_v41, %v143_v16  ;;  %v332_v45 = vmul.f32 %v331_v5, %v329_v21  ;;  %v557_v47 = vsel %vm550_vm7, %v553_v63, %v556_v42  ;;  %vm1862_vm5 = vcmask 64512  }
  0x89   :  { %v145_v44 = vsel %vm135_vm8, nan, %v144_v43  ;;  %v558_v36 = vsel %vm135_vm8, nan, %v557_v47 }
  0x8a   :  { %v333_v48 = vxor.u32 2147483648, %v332_v45  ;;  %v899_v50 = vrot.slane %v558_v36, 7  ;;  %v873_v23 = vrot.slane %v145_v44, 1  ;;  %v883_v6 = vrot.slane %v558_v36, 1 }
  0x8c   :  { %v334_v7 = vsel %vm251_vm9, %v333_v48, %v332_v45  ;;  %v904_v51 = vsel %vm903_vm4, %v145_v44, %v899_v50 }
  0x8d   :  { %v337_v53 = vsel %vm250_vm10, %v2210_v4, %v334_v7  ;;  %v906_v55 = vpack.c.bf16 %v904_v51, %v904_v51 }
  0x8e   :  { %2028 = vcosq.f32 %v337_v53 }
  0x8f   :  { %2030 = vsinq.f32 %v337_v53  ;;  %v914_v56 = vsel %vm903_vm4, %v906_v55, 0  ;;  %vm759_vm4 = vcmp.eq.s32.totalorder %v757_v60, 0 }
  0x90   :  { %934 = vmatpush1.bf16.msra.mxu0 %v914_v56 }
  0x93   :  { %1969 = vmatmul.mubr.msk.bf16.vlgmr.msra.gmra.mxu0 %vm909_vm11, %v908_v19 }
  0x94   :  { %1196 = vmatprep.mubr.bf16.mxu0 %v2085_v12 }
  0x9b   :  { %v2029_v61 = vpop.eup %2028 }
  0x9c   :  { %v2031_v62 = vpop.eup %2030  ;;  %v348_v2 = vxor.u32 2147483648, %v2029_v61 }
  0x9d   :  { %v345_v10 = vxor.u32 2147483648, %v2031_v62 }
  0x9e   :  { %v349_v58 = vsel %vm347_vm12, %v348_v2, %v2031_v62  ;;  %v764_v34 = vsel %vm762_vm13, %v348_v2, %v2031_v62 }
  0x9f   :  { %v346_v46 = vsel %vm344_vm14, %v2029_v61, %v345_v10  ;;  %v761_v14 = vsel %vm759_vm4, %v2029_v61, %v345_v10 }
  0xa0   :  { %v350_v15 = vsel %vm343_vm0, %v346_v46, %v349_v58  ;;  %v765_v1 = vsel %vm758_vm1, %v761_v14, %v764_v34 }
  0xa1   :  { %v2440_v26 = vsel %vm341_vm15, nan, %v350_v15  ;;  %v2442_v17 = vsel %vm341_vm15, nan, %v765_v1 }
  0xa2   :  { %v877_v18 = vmul.f32 %v873_v23, %v2440_v26  ;;  %v887_v9 = vmul.f32 %v883_v6, %v2440_v26  ;;  %v891_v4 = vmul.f32 %v873_v23, %v2442_v17  ;;  %v895_v33 = vmul.f32 %v883_v6, %v2442_v17 }
  0xa4   :  { %879 = vst [vmem:[#allocation2] sm:$0x7f] %v877_v18  ;;  %889 = vst [vmem:[#allocation3] sm:$0x7f] %v887_v9 }
  0xa5   :  { %893 = vst [vmem:[#allocation4] sm:$0x7f] %v891_v4  ;;  %897 = vst [vmem:[#allocation5] sm:$0x7f] %v895_v33 }
  0xab   :  { %v974_v30 = vld [vmem:[#allocation3] ss:$8 sm:$0x3]  ;;  %v960_v35 = vld [vmem:[#allocation2] ss:$8 sm:$0x3] }
  0xac   :  { %v1002_v25 = vld [vmem:[#allocation5] ss:$8 sm:$0x3]  ;;  %v979_v3 = vrot.slane %v974_v30, %v2451_v22  ;;  %v988_v32 = vld [vmem:[#allocation4] ss:$8 sm:$0x3]  ;;  %v983_v37 = vrot.slane %v974_v30, %v2454_v29  ;;  %v965_v0 = vrot.slane %v960_v35, %v2451_v22  ;;  %v969_v5 = vrot.slane %v960_v35, %v2454_v29 }
  0xad   :  { %v1007_v27 = vrot.slane %v1002_v25, %v2451_v22  ;;  %v1011_v39 = vrot.slane %v1002_v25, %v2454_v29  ;;  %v993_v38 = vrot.slane %v988_v32, %v2451_v22  ;;  %v997_v13 = vrot.slane %v988_v32, %v2454_v29  ;;  %v1097_v19 = vld [vmem:[#allocation3 + $0x1] ss:$8 sm:$0x3]  ;;  %v1082_v59 = vld [vmem:[#allocation2 + $0x1] ss:$8 sm:$0x3] }
  0xae   :  { %v1127_v49 = vld [vmem:[#allocation5 + $0x1] ss:$8 sm:$0x3]  ;;  %v1102_v60 = vrot.slane %v1097_v19, %v2451_v22  ;;  %v1112_v62 = vld [vmem:[#allocation4 + $0x1] ss:$8 sm:$0x3]  ;;  %v1106_v2 = vrot.slane %v1097_v19, %v2454_v29  ;;  %v1087_v58 = vrot.slane %v1082_v59, %v2451_v22  ;;  %v1091_v14 = vrot.slane %v1082_v59, %v2454_v29 }
  0xaf   :  { %v1132_v61 = vrot.slane %v1127_v49, %v2451_v22  ;;  %v1136_v34 = vrot.slane %v1127_v49, %v2454_v29  ;;  %v1117_v6 = vrot.slane %v1112_v62, %v2451_v22  ;;  %v1121_v1 = vrot.slane %v1112_v62, %v2454_v29 }
 0x153   :  { %v953_v20 = vpop.f32.mrf.mxu0 }
 0x154   :  { %v986_v11 = vmul.f32 %v979_v3, %v953_v20  ;;  %v1014_v40 = vmul.f32 %v1007_v27, %v953_v20  ;;  %v972_v43 = vmul.f32 %v965_v0, %v953_v20  ;;  %v1000_v45 = vmul.f32 %v993_v38, %v953_v20 }
 0x155   :  { %v955_v16 = vpop.f32.mrf.mxu0 }
 0x156   :  { %v1018_v21 = vrot.slane %v986_v11, 4  ;;  %v1024_v42 = vrot.slane %v1014_v40, 4  ;;  %v987_v41 = vmul.f32 %v983_v37, %v955_v16  ;;  %v1015_v63 = vmul.f32 %v1011_v39, %v955_v16 }
 0x157   :  { %v957_v47 = vpop.f32.mrf.mxu0  ;;  %v973_v44 = vmul.f32 %v969_v5, %v955_v16  ;;  %v1001_v52 = vmul.f32 %v997_v13, %v955_v16  ;;  %v1971_v5 = vld [vmem:[%s2591_s2 + $0x2] sm:$0x3]  ;;  %v1221_v13 = vld [vmem:[#allocation3 + $0x2] ss:$8 sm:$0x3] }
 0x158   :  { %v1019_v36 = vrot.slane %v987_v41, 4  ;;  %v1025_v48 = vrot.slane %v1015_v63, 4  ;;  %v1029_v7 = vsel %vm1028_vm2, %v972_v43, %v1018_v21  ;;  %v1031_v51 = vsel %vm1028_vm2, %v1000_v45, %v1024_v42  ;;  %v1251_v16 = vld [vmem:[#allocation5 + $0x2] ss:$8 sm:$0x3] }
 0x159   :  { %v958_v50 = vpop.f32.mrf.mxu0  ;;  %v1033_v56 = vpack.c.bf16 %v1031_v51, %v1029_v7  ;;  %v1206_v21 = vld [vmem:[#allocation2 + $0x2] ss:$8 sm:$0x3]  ;;  %v1226_v42 = vrot.slane %v1221_v13, %v2451_v22  ;;  %v1256_v41 = vrot.slane %v1251_v16, %v2451_v22  ;;  %v1230_v43 = vrot.slane %v1221_v13, %v2454_v29 }
 0x15a   :  { %v1030_v28 = vsel %vm1028_vm2, %v973_v44, %v1019_v36  ;;  %v1032_v53 = vsel %vm1028_vm2, %v1001_v52, %v1025_v48  ;;  %v1236_v63 = vld [vmem:[#allocation4 + $0x2] ss:$8 sm:$0x3]  ;;  %v1211_v47 = vrot.slane %v1206_v21, %v2451_v22  ;;  %v1260_v44 = vrot.slane %v1251_v16, %v2454_v29 }
 0x15b   :  { %v1034_v55 = vpack.c.bf16 %v1032_v53, %v1030_v28  ;;  %v1241_v36 = vrot.slane %v1236_v63, %v2451_v22  ;;  %v1215_v50 = vrot.slane %v1206_v21, %v2454_v29  ;;  %v1245_v51 = vrot.slane %v1236_v63, %v2454_v29 }
 0x15d   :  { %1054 = vmatprep.subr.bf16.mxu1 %v1034_v55 }
 0x15e   :  { %1055 = vmatpush1.bf16.msra.mxu1 %v1033_v56 }
 0x161   :  { %1970 = vmatmul.mubr.msk.bf16.vlgmr.msra.gmra.mxu1 %vm1036_vm3, %v1035_v57 }
 0x162   :  { %1320 = vmatprep.mubr.bf16.mxu1 %v2085_v12 }
 0x221   :  { %v1074_v10 = vpop.f32.mrf.mxu1 }
 0x222   :  { %v1109_v23 = vmul.f32 %v1102_v60, %v1074_v10  ;;  %v1139_v46 = vmul.f32 %v1132_v61, %v1074_v10  ;;  %v1094_v30 = vmul.f32 %v1087_v58, %v1074_v10  ;;  %v1124_v25 = vmul.f32 %v1117_v6, %v1074_v10 }
 0x223   :  { %v1076_v15 = vpop.f32.mrf.mxu1 }
 0x224   :  { %v1143_v18 = vrot.slane %v1109_v23, 4  ;;  %v1149_v9 = vrot.slane %v1139_v46, 4  ;;  %v1110_v4 = vmul.f32 %v1106_v2, %v1076_v15  ;;  %v1140_v33 = vmul.f32 %v1136_v34, %v1076_v15 }
 0x225   :  { %v1078_v31 = vpop.f32.mrf.mxu1  ;;  %v1095_v35 = vmul.f32 %v1091_v14, %v1076_v15  ;;  %v1125_v32 = vmul.f32 %v1121_v1, %v1076_v15  ;;  %v1973_v14 = vld [vmem:[%s2591_s2 + $0x4] sm:$0x3]  ;;  %v1345_v15 = vld [vmem:[#allocation3 + $0x3] ss:$8 sm:$0x3] }
 0x226   :  { %v1144_v3 = vrot.slane %v1110_v4, 4  ;;  %v1150_v27 = vrot.slane %v1140_v33, 4  ;;  %v1153_v20 = vsel %vm1028_vm2, %v1094_v30, %v1143_v18  ;;  %v1155_v0 = vsel %vm1028_vm2, %v1124_v25, %v1149_v9  ;;  %v1375_v1 = vld [vmem:[#allocation5 + $0x3] ss:$8 sm:$0x3] }
 0x227   :  { %v1079_v37 = vpop.f32.mrf.mxu1  ;;  %v1157_v40 = vpack.c.bf16 %v1155_v0, %v1153_v20  ;;  %v1330_v18 = vld [vmem:[#allocation2 + $0x3] ss:$8 sm:$0x3]  ;;  %v1350_v9 = vrot.slane %v1345_v15, %v2451_v22  ;;  %v1380_v4 = vrot.slane %v1375_v1, %v2451_v22  ;;  %v1354_v31 = vrot.slane %v1345_v15, %v2454_v29 }
 0x228   :  { %v1154_v39 = vsel %vm1028_vm2, %v1095_v35, %v1144_v3  ;;  %v1156_v38 = vsel %vm1028_vm2, %v1125_v32, %v1150_v27  ;;  %v1360_v33 = vld [vmem:[#allocation4 + $0x3] ss:$8 sm:$0x3]  ;;  %v1335_v25 = vrot.slane %v1330_v18, %v2451_v22  ;;  %v1384_v35 = vrot.slane %v1375_v1, %v2454_v29 }
 0x229   :  { %v1158_v11 = vpack.c.bf16 %v1156_v38, %v1154_v39  ;;  %v1365_v32 = vrot.slane %v1360_v33, %v2451_v22  ;;  %v1339_v37 = vrot.slane %v1330_v18, %v2454_v29  ;;  %v1369_v20 = vrot.slane %v1360_v33, %v2454_v29 }
 0x22b   :  { %1178 = vmatprep.subr.bf16.mxu0 %v1158_v11 }
 0x22c   :  { %1179 = vmatpush1.bf16.msra.mxu0 %v1157_v40 }
 0x22f   :  { %1972 = vmatmul.mubr.msk.bf16.vlgmr.msra.gmra.mxu0 %vm1036_vm3, %v1971_v5 }
 0x230   :  { %1444 = vmatprep.mubr.bf16.mxu0 %v2085_v12 }
 0x2ef   :  { %v1198_v45 = vpop.f32.mrf.mxu0 }
 0x2f0   :  { %v1233_v52 = vmul.f32 %v1226_v42, %v1198_v45  ;;  %v1263_v48 = vmul.f32 %v1256_v41, %v1198_v45  ;;  %v1218_v19 = vmul.f32 %v1211_v47, %v1198_v45  ;;  %v1248_v49 = vmul.f32 %v1241_v36, %v1198_v45 }
 0x2f1   :  { %v1200_v7 = vpop.f32.mrf.mxu0 }
 0x2f2   :  { %v1267_v28 = vrot.slane %v1233_v52, 4  ;;  %v1273_v53 = vrot.slane %v1263_v48, 4  ;;  %v1234_v55 = vmul.f32 %v1230_v43, %v1200_v7  ;;  %v1264_v56 = vmul.f32 %v1260_v44, %v1200_v7 }
 0x2f3   :  { %v1202_v57 = vpop.f32.mrf.mxu0  ;;  %v1219_v59 = vmul.f32 %v1215_v50, %v1200_v7  ;;  %v1249_v61 = vmul.f32 %v1245_v51, %v1200_v7  ;;  %v1975_v50 = vld [vmem:[%s2591_s2 + $0x6] sm:$0x3]  ;;  %v1469_v7 = vld [vmem:[#allocation3 + $0x4] ss:$8 sm:$0x3] }
 0x2f4   :  { %v1268_v60 = vrot.slane %v1234_v55, 4  ;;  %v1274_v62 = vrot.slane %v1264_v56, 4  ;;  %v1277_v58 = vsel %vm1028_vm2, %v1218_v19, %v1267_v28  ;;  %v1279_v34 = vsel %vm1028_vm2, %v1248_v49, %v1273_v53  ;;  %v1499_v51 = vld [vmem:[#allocation5 + $0x4] ss:$8 sm:$0x3] }
 0x2f5   :  { %v1203_v2 = vpop.f32.mrf.mxu0  ;;  %v1281_v46 = vpack.c.bf16 %v1279_v34, %v1277_v58  ;;  %v1454_v28 = vld [vmem:[#allocation2 + $0x4] ss:$8 sm:$0x3]  ;;  %v1474_v53 = vrot.slane %v1469_v7, %v2451_v22  ;;  %v1504_v55 = vrot.slane %v1499_v51, %v2451_v22  ;;  %v1478_v57 = vrot.slane %v1469_v7, %v2454_v29 }
 0x2f6   :  { %v1278_v10 = vsel %vm1028_vm2, %v1219_v59, %v1268_v60  ;;  %v1280_v23 = vsel %vm1028_vm2, %v1249_v61, %v1274_v62  ;;  %v1484_v56 = vld [vmem:[#allocation4 + $0x4] ss:$8 sm:$0x3]  ;;  %v1459_v49 = vrot.slane %v1454_v28, %v2451_v22  ;;  %v1508_v59 = vrot.slane %v1499_v51, %v2454_v29 }
 0x2f7   :  { %v1282_v6 = vpack.c.bf16 %v1280_v23, %v1278_v10  ;;  %v1489_v61 = vrot.slane %v1484_v56, %v2451_v22  ;;  %v1463_v2 = vrot.slane %v1454_v28, %v2454_v29  ;;  %v1493_v58 = vrot.slane %v1484_v56, %v2454_v29 }
 0x2f9   :  { %1302 = vmatprep.subr.bf16.mxu1 %v1282_v6 }
 0x2fa   :  { %1303 = vmatpush1.bf16.msra.mxu1 %v1281_v46 }
 0x2fd   :  { %1974 = vmatmul.mubr.msk.bf16.vlgmr.msra.gmra.mxu1 %vm1036_vm3, %v1973_v14 }
 0x2fe   :  { %1568 = vmatprep.mubr.bf16.mxu1 %v2085_v12 }
 0x3bd   :  { %v1322_v30 = vpop.f32.mrf.mxu1 }
 0x3be   :  { %v1357_v3 = vmul.f32 %v1350_v9, %v1322_v30  ;;  %v1387_v27 = vmul.f32 %v1380_v4, %v1322_v30  ;;  %v1342_v13 = vmul.f32 %v1335_v25, %v1322_v30  ;;  %v1372_v16 = vmul.f32 %v1365_v32, %v1322_v30 }
 0x3bf   :  { %v1324_v39 = vpop.f32.mrf.mxu1 }
 0x3c0   :  { %v1391_v0 = vrot.slane %v1357_v3, 4  ;;  %v1397_v38 = vrot.slane %v1387_v27, 4  ;;  %v1358_v11 = vmul.f32 %v1354_v31, %v1324_v39  ;;  %v1388_v40 = vmul.f32 %v1384_v35, %v1324_v39 }
 0x3c1   :  { %v1326_v5 = vpop.f32.mrf.mxu1  ;;  %v1343_v21 = vmul.f32 %v1339_v37, %v1324_v39  ;;  %v1373_v41 = vmul.f32 %v1369_v20, %v1324_v39  ;;  %v1977_v37 = vld [vmem:[%s2591_s2 + $0x8] sm:$0x3]  ;;  %v1593_v39 = vld [vmem:[#allocation3 + $0x5] ss:$8 sm:$0x3] }
 0x3c2   :  { %v1392_v42 = vrot.slane %v1358_v11, 4  ;;  %v1398_v63 = vrot.slane %v1388_v40, 4  ;;  %v1401_v47 = vsel %vm1028_vm2, %v1342_v13, %v1391_v0  ;;  %v1403_v44 = vsel %vm1028_vm2, %v1372_v16, %v1397_v38  ;;  %v1623_v20 = vld [vmem:[#allocation5 + $0x5] ss:$8 sm:$0x3] }
 0x3c3   :  { %v1327_v43 = vpop.f32.mrf.mxu1  ;;  %v1405_v48 = vpack.c.bf16 %v1403_v44, %v1401_v47  ;;  %v1578_v0 = vld [vmem:[#allocation2 + $0x5] ss:$8 sm:$0x3]  ;;  %v1598_v38 = vrot.slane %v1593_v39, %v2451_v22  ;;  %v1628_v11 = vrot.slane %v1623_v20, %v2451_v22  ;;  %v1602_v5 = vrot.slane %v1593_v39, %v2454_v29 }
 0x3c4   :  { %v1402_v45 = vsel %vm1028_vm2, %v1343_v21, %v1392_v42  ;;  %v1404_v52 = vsel %vm1028_vm2, %v1373_v41, %v1398_v63  ;;  %v1608_v40 = vld [vmem:[#allocation4 + $0x5] ss:$8 sm:$0x3]  ;;  %v1583_v16 = vrot.slane %v1578_v0, %v2451_v22  ;;  %v1632_v21 = vrot.slane %v1623_v20, %v2454_v29 }
 0x3c5   :  { %v1406_v36 = vpack.c.bf16 %v1404_v52, %v1402_v45  ;;  %v1613_v41 = vrot.slane %v1608_v40, %v2451_v22  ;;  %v1587_v43 = vrot.slane %v1578_v0, %v2454_v29  ;;  %v1617_v47 = vrot.slane %v1608_v40, %v2454_v29 }
 0x3c7   :  { %1426 = vmatprep.subr.bf16.mxu0 %v1406_v36 }
 0x3c8   :  { %1427 = vmatpush1.bf16.msra.mxu0 %v1405_v48 }
 0x3cb   :  { %1976 = vmatmul.mubr.msk.bf16.vlgmr.msra.gmra.mxu0 %vm1036_vm3, %v1975_v50 }
 0x3cc   :  { %1692 = vmatprep.mubr.bf16.mxu0 %v2085_v12 }
 0x48b   :  { %v1446_v19 = vpop.f32.mrf.mxu0 }
 0x48c   :  { %v1481_v60 = vmul.f32 %v1474_v53, %v1446_v19  ;;  %v1511_v62 = vmul.f32 %v1504_v55, %v1446_v19  ;;  %v1466_v15 = vmul.f32 %v1459_v49, %v1446_v19  ;;  %v1496_v1 = vmul.f32 %v1489_v61, %v1446_v19 }
 0x48d   :  { %v1448_v10 = vpop.f32.mrf.mxu0 }
 0x48e   :  { %v1515_v34 = vrot.slane %v1481_v60, 4  ;;  %v1521_v23 = vrot.slane %v1511_v62, 4  ;;  %v1482_v6 = vmul.f32 %v1478_v57, %v1448_v10  ;;  %v1512_v46 = vmul.f32 %v1508_v59, %v1448_v10 }
 0x48f   :  { %v1450_v14 = vpop.f32.mrf.mxu0  ;;  %v1467_v18 = vmul.f32 %v1463_v2, %v1448_v10  ;;  %v1497_v4 = vmul.f32 %v1493_v58, %v1448_v10  ;;  %v1979_v2 = vld [vmem:[%s2591_s2 + $0xa] sm:$0x3]  ;;  %v1717_v10 = vld [vmem:[#allocation3 + $0x6] ss:$8 sm:$0x3] }
 0x490   :  { %v1516_v9 = vrot.slane %v1482_v6, 4  ;;  %v1522_v33 = vrot.slane %v1512_v46, 4  ;;  %v1525_v25 = vsel %vm1028_vm2, %v1466_v15, %v1515_v34  ;;  %v1527_v35 = vsel %vm1028_vm2, %v1496_v1, %v1521_v23  ;;  %v1747_v58 = vld [vmem:[#allocation5 + $0x6] ss:$8 sm:$0x3] }
 0x491   :  { %v1451_v31 = vpop.f32.mrf.mxu0  ;;  %v1529_v27 = vpack.c.bf16 %v1527_v35, %v1525_v25  ;;  %v1702_v34 = vld [vmem:[#allocation2 + $0x6] ss:$8 sm:$0x3]  ;;  %v1722_v23 = vrot.slane %v1717_v10, %v2451_v22  ;;  %v1752_v6 = vrot.slane %v1747_v58, %v2451_v22  ;;  %v1726_v14 = vrot.slane %v1717_v10, %v2454_v29 }
 0x492   :  { %v1526_v30 = vsel %vm1028_vm2, %v1467_v18, %v1516_v9  ;;  %v1528_v3 = vsel %vm1028_vm2, %v1497_v4, %v1522_v33  ;;  %v1732_v46 = vld [vmem:[#allocation4 + $0x6] ss:$8 sm:$0x3]  ;;  %v1707_v1 = vrot.slane %v1702_v34, %v2451_v22  ;;  %v1756_v18 = vrot.slane %v1747_v58, %v2454_v29 }
 0x493   :  { %v1530_v32 = vpack.c.bf16 %v1528_v3, %v1526_v30  ;;  %v1737_v4 = vrot.slane %v1732_v46, %v2451_v22  ;;  %v1741_v30 = vrot.slane %v1732_v46, %v2454_v29 }
 0x495   :  { %1550 = vmatprep.subr.bf16.mxu1 %v1530_v32 }
 0x496   :  { %1551 = vmatpush1.bf16.msra.mxu1 %v1529_v27 }
 0x499   :  { %1978 = vmatmul.mubr.msk.bf16.vlgmr.msra.gmra.mxu1 %vm1036_vm3, %v1977_v37 }
 0x49a   :  { %1816 = vmatprep.mubr.bf16.mxu1 %v2085_v12 }
 0x559   :  { %v1570_v13 = vpop.f32.mrf.mxu1 }
 0x55a   :  { %v1605_v42 = vmul.f32 %v1598_v38, %v1570_v13  ;;  %v1635_v63 = vmul.f32 %v1628_v11, %v1570_v13  ;;  %v1590_v7 = vmul.f32 %v1583_v16, %v1570_v13  ;;  %v1620_v51 = vmul.f32 %v1613_v41, %v1570_v13 }
 0x55b   :  { %v1572_v45 = vpop.f32.mrf.mxu1  ;;  %v1827_v41 = vsub.s32 7, %v2448_v24 }
 0x55c   :  { %v1639_v44 = vrot.slane %v1605_v42, 4  ;;  %v1645_v52 = vrot.slane %v1635_v63, 4  ;;  %v1606_v36 = vmul.f32 %v1602_v5, %v1572_v45  ;;  %v1636_v48 = vmul.f32 %v1632_v21, %v1572_v45  ;;  %v1981_v42 = vld [vmem:[%s2591_s2 + $0xc] sm:$0x3] }
 0x55d   :  { %v1574_v50 = vpop.f32.mrf.mxu1  ;;  %v1591_v28 = vmul.f32 %v1587_v43, %v1572_v45  ;;  %v1621_v55 = vmul.f32 %v1617_v47, %v1572_v45  ;;  %v1838_v63 = vrot.slane %v2442_v17, %v1827_v41  ;;  %v1828_v43 = vrot.slane %v2440_v26, %v1827_v41 }
 0x55e   :  { %v1640_v53 = vrot.slane %v1606_v36, 4  ;;  %v1646_v56 = vrot.slane %v1636_v48, 4  ;;  %v1649_v49 = vsel %vm1028_vm2, %v1590_v7, %v1639_v44  ;;  %v1651_v59 = vsel %vm1028_vm2, %v1620_v51, %v1645_v52 }
 0x55f   :  { %v1575_v57 = vpop.f32.mrf.mxu1  ;;  %v1653_v62 = vpack.c.bf16 %v1651_v59, %v1649_v49  ;;  %v1842_v45 = vrot.slane %v2411_v8, %v1827_v41  ;;  %v1832_v52 = vrot.slane %v2407_v54, %v1827_v41  ;;  %v2015_v54 = vld [vmem:[%s2592_s3] sm:$0x1f]  }
 0x560   :  { %v1650_v19 = vsel %vm1028_vm2, %v1591_v28, %v1640_v53  ;;  %v1652_v60 = vsel %vm1028_vm2, %v1621_v55, %v1646_v56 }
 0x561   :  { %v1654_v61 = vpack.c.bf16 %v1652_v60, %v1650_v19 }
 0x563   :  { %1674 = vmatprep.subr.bf16.mxu0 %v1654_v61 }
 0x564   :  { %1675 = vmatpush1.bf16.msra.mxu0 %v1653_v62 }
 0x567   :  { %1980 = vmatmul.mubr.msk.bf16.vlgmr.msra.gmra.mxu0 %vm1036_vm3, %v1979_v2 }
 0x568   :  { %1904 = vmatprep.mubr.bf16.mxu0 %v2085_v12  ;;  %v1711_v12 = vrot.slane %v1702_v34, %v2454_v29 }
 0x627   :  { %v1694_v15 = vpop.f32.mrf.mxu0 }
 0x628   :  { %v1729_v9 = vmul.f32 %v1722_v23, %v1694_v15  ;;  %v1759_v33 = vmul.f32 %v1752_v6, %v1694_v15  ;;  %v1714_v37 = vmul.f32 %v1707_v1, %v1694_v15  ;;  %v1744_v39 = vmul.f32 %v1737_v4, %v1694_v15 }
 0x629   :  { %v1696_v31 = vpop.f32.mrf.mxu0 }
 0x62a   :  { %v1763_v25 = vrot.slane %v1729_v9, 4  ;;  %v1769_v35 = vrot.slane %v1759_v33, 4  ;;  %v1730_v3 = vmul.f32 %v1726_v14, %v1696_v31  ;;  %v1760_v32 = vmul.f32 %v1756_v18, %v1696_v31 }
 0x62b   :  { %v1698_v27 = vpop.f32.mrf.mxu0  ;;  %v1715_v20 = vmul.f32 %v1711_v12, %v1696_v31  ;;  %v1745_v38 = vmul.f32 %v1741_v30, %v1696_v31 }
 0x62c   :  { %v1764_v0 = vrot.slane %v1730_v3, 4  ;;  %v1770_v11 = vrot.slane %v1760_v32, 4  ;;  %v1773_v5 = vsel %vm1028_vm2, %v1714_v37, %v1763_v25  ;;  %v1775_v13 = vsel %vm1028_vm2, %v1744_v39, %v1769_v35 }
 0x62d   :  { %v1699_v40 = vpop.f32.mrf.mxu0  ;;  %v1777_v21 = vpack.c.bf16 %v1775_v13, %v1773_v5 }
 0x62e   :  { %v1774_v22 = vsel %vm1028_vm2, %v1715_v20, %v1764_v0  ;;  %v1776_v29 = vsel %vm1028_vm2, %v1745_v38, %v1770_v11 }
 0x62f   :  { %v1778_v16 = vpack.c.bf16 %v1776_v29, %v1774_v22 }
 0x631   :  { %1798 = vmatprep.subr.bf16.mxu1 %v1778_v16 }
 0x632   :  { %1799 = vmatpush1.bf16.msra.mxu1 %v1777_v21 }
 0x635   :  { %1982 = vmatmul.mubr.msk.bf16.vlgmr.msra.gmra.mxu1 %vm1036_vm3, %v1981_v42 }
 0x6f5   :  { %v1818_v47 = vpop.f32.mrf.mxu1 }
 0x6f6   :  { %v1843_v44 = vmul.f32 %v1838_v63, %v1818_v47  ;;  %v1833_v48 = vmul.f32 %v1828_v43, %v1818_v47 }
 0x6f7   :  { %v1820_v36 = vpop.f32.mrf.mxu1 }
 0x6f8   :  { %v1847_v50 = vrot.slane %v1843_v44, 4  ;;  %v1844_v7 = vmul.f32 %v1842_v45, %v1820_v36  ;;  %v1834_v28 = vmul.f32 %v1832_v52, %v1820_v36 }
 0x6f9   :  { %v1822_v51 = vpop.f32.mrf.mxu1 }
 0x6fa   :  { %v1848_v53 = vrot.slane %v1844_v7, 4  ;;  %v1851_v55 = vsel %vm1028_vm2, %v1833_v48, %v1847_v50 }
 0x6fb   :  { %v1823_v24 = vpop.f32.mrf.mxu1  ;;  %v1853_v56 = vpack.c.bf16 %v1851_v55, %v1851_v55 }
 0x6fc   :  { %v1852_v17 = vsel %vm1028_vm2, %v1834_v28, %v1848_v53 }
 0x6fd   :  { %v1854_v26 = vpack.c.bf16 %v1852_v17, %v1852_v17  ;;  %v1867_v8 = vsel %vm1028_vm2, %v1853_v56, 0 }
 0x6ff   :  { %1984 = vmatprep.subr.msk.bf16.mxu0 %vm1028_vm2, %v1854_v26 }
 0x700   :  { %1887 = vmatpush1.bf16.msra.mxu0 %v1867_v8 }
 0x703   :  { %1985 = vmatmul.mubr.msk.bf16.vlgmr.msra.gmra.mxu0 %vm1862_vm5, %v2015_v54 }
 0x7c3   :  { %v1906_v57 = vpop.f32.mrf.mxu0 }
 0x7c4   :  { %1915 = vst [vmem:[#allocation9] sm:$0xff] %v1906_v57 }
 0x7c5   :  { %v1908_v19 = vpop.f32.mrf.mxu0 }
 0x7c6   :  { %1916 = vst [vmem:[#allocation9 + $0x8] sm:$0xff] %v1908_v19 }
 0x7c7   :  { %v1910_v49 = vpop.f32.mrf.mxu0 }
 0x7c8   :  { %1917 = vst [vmem:[#allocation9 + $0x10] sm:$0x3] %v1910_v49 }
 0x7c9   :  { %v1912_v59 = vpop.f32.mrf.mxu0 }
 0x7ca   :  { %1918 = vst [vmem:[#allocation9 + $0x18] sm:$0x3] %v1912_v59 }
 0x7cb   :  { %2063 = shalt.err (!%p2060_p9)
}
 0x7cc   :  { %s2087_s3 = smov 256   ;;  %s2088_s14 = smov 16  }
 0x7cd   :  { %1930 = dma.vmem_to_hbm [thread:$0]  %s1925_s12, 512, %s2593_s4, [#allocation8], %s2087_s3, %s2087_s3, %s2088_s14  }
 0x7ce   :  { %2074 = dma.done.wait [#allocation8], 512  }
 0x7cf   :  { %2075 = vsyncadd [#allocation8], 4294966784 }
 0x7d0   :  { %1934 = vsyncpa [#allocation7], 1 }
 0x7d1   :  { %1935 = vsyncpa [#allocation8], 1 }

</bundles_post_ra>
